<compile_context>
chip_gen: v7x
topology: tpu7x:2x2x1
jax: 0.10.0
libtpu: 0.0.40
codegen_flags: <defaults>
</compile_context>

<pallas_src>
import math
import functools

import jax
import jax.numpy as jnp
from jax.experimental import pallas as pl
from jax.experimental.pallas import tpu as pltpu

# --- scaled-down BERT config (bert-base: H=768, NH=12, I=3072, L=12) ---------
VOCAB = 100
SEQ = 8
HIDDEN = 32
NUM_HEADS = 4
HEAD_DIM = HIDDEN // NUM_HEADS
INTERMEDIATE = 64
NUM_LAYERS = 2
NUM_OUT = 5
NUM_OUT_PAD = 128          # lane-dense classifier output, sliced back to 5 outside
HIDDEN_PAD = 128           # lane-dense CLS-representation output, sliced outside
NEG_PAD = -1e9             # bias for padded logit columns -> exp() == 0
LN_EPS = 1e-12


# ------------------------------ fused kernel ---------------------------------
def bert_fused_kernel(
    x_ref,                       # (S, H)   f32 embedding sum for this batch elem
    emb_g_ref, emb_b_ref,        # (1, H)   f32
    wqkv_ref, bqkv_ref,          # (H, 3H)  bf16 ; (1, 3H) f32   (this layer)
    wo_ref, bo_ref,              # (H, H)   bf16 ; (1, H)  f32
    g1_ref, be1_ref,             # (1, H)   f32
    w1_ref, b1_ref,              # (H, I)   bf16 ; (1, I)  f32
    w2_ref, b2_ref,              # (I, H)   bf16 ; (1, H)  f32
    g2_ref, be2_ref,             # (1, H)   f32
    clsw_ref, clsb_ref,          # (H, PAD) bf16 ; (1, PAD) f32
    hid_ref,                     # out: (1, HIDDEN_PAD)  f32  CLS hidden state (padded)
    prob_ref,                    # out: (1, NUM_OUT_PAD) f32  CLS softmax probs (padded)
    x_scr,                       # scratch: (S, H) f32 activation carry across layers
):
    layer = pl.program_id(1)

    def layer_norm(v, g, b):
        mu = jnp.mean(v, axis=-1, keepdims=True)
        var = jnp.mean(jnp.square(v - mu), axis=-1, keepdims=True)
        return (v - mu) * jax.lax.rsqrt(var + LN_EPS) * g + b

    def gelu(v):
        # TODO(synk): BERT uses erf-GELU; tanh approximation deviates ~1e-3.
        c = math.sqrt(2.0 / math.pi)
        return 0.5 * v * (1.0 + jnp.tanh(c * (v + 0.044715 * v * v * v)))

    # first layer: fuse the embedding layernorm into the activation carry
    @pl.when(layer == 0)
    def _():
        x_scr[...] = layer_norm(x_ref[...], emb_g_ref[...], emb_b_ref[...])

    x = x_scr[...]                                               # (S, H) f32

    # ---- attention: one fused lane-dense QKV projection ----
    qkv = jnp.dot(x.astype(jnp.bfloat16), wqkv_ref[...],
                  preferred_element_type=jnp.float32) + bqkv_ref[...]   # (S, 3H)

    def split_heads(t):                                          # (S, H) -> (NH, S, HD)
        return jnp.stack(
            [t[:, h * HEAD_DIM:(h + 1) * HEAD_DIM] for h in range(NUM_HEADS)],
            axis=0)

    q = split_heads(qkv[:, 0 * HIDDEN:1 * HIDDEN]).astype(jnp.bfloat16)
    k = split_heads(qkv[:, 1 * HIDDEN:2 * HIDDEN]).astype(jnp.bfloat16)
    v = split_heads(qkv[:, 2 * HIDDEN:3 * HIDDEN]).astype(jnp.bfloat16)

    # scores (1/sqrt(HD) already folded into the Q columns of wqkv/bqkv)
    s = jnp.einsum("nqd,nkd->nqk", q, k,
                   preferred_element_type=jnp.float32)           # (NH, S, S)
    s = s - jnp.max(s, axis=-1, keepdims=True)
    e = jnp.exp(s)
    # approx reciprocal runs on the EUP slot; attn probs sum to 1 +- small rel. err.
    p = e * pl.reciprocal(jnp.sum(e, axis=-1, keepdims=True), approx=True)

    ctx = jnp.einsum("nqk,nkd->nqd", p.astype(jnp.bfloat16), v,
                     preferred_element_type=jnp.float32)         # (NH, S, HD)
    # heads merged back into lanes -> ONE (S,H)@(H,H) output projection
    ctx = jnp.concatenate([ctx[h] for h in range(NUM_HEADS)], axis=-1)  # (S, H)
    attn = jnp.dot(ctx.astype(jnp.bfloat16), wo_ref[...],
                   preferred_element_type=jnp.float32) + bo_ref[...]

    h1 = layer_norm(x + attn, g1_ref[...], be1_ref[...])

    # ---- FFN ----
    ffn = jnp.dot(h1.astype(jnp.bfloat16), w1_ref[...],
                  preferred_element_type=jnp.float32) + b1_ref[...]
    ffn = gelu(ffn)
    ffn = jnp.dot(ffn.astype(jnp.bfloat16), w2_ref[...],
                  preferred_element_type=jnp.float32) + b2_ref[...]
    x_new = layer_norm(h1 + ffn, g2_ref[...], be2_ref[...])
    x_scr[...] = x_new

    # ---- CLS-only classifier head + exact softmax at the last layer ----
    @pl.when(layer == NUM_LAYERS - 1)
    def _():
        x_cls = x_new[0:1, :]                                    # (1, H) CLS row
        hid_ref[...] = jnp.concatenate(
            [x_cls, jnp.zeros((1, HIDDEN_PAD - HIDDEN), jnp.float32)], axis=-1)
        logits = jnp.dot(x_cls.astype(jnp.bfloat16), clsw_ref[...],
                         preferred_element_type=jnp.float32) + clsb_ref[...]
        # Padded columns carry bias NEG_PAD so exp(logit - max) == 0.0 exactly in
        # f32; invariant: no real logit ever approaches NEG_PAD (weights ~0.02).
        m = jnp.max(logits, axis=-1, keepdims=True)
        ez = jnp.exp(logits - m)
        prob_ref[...] = ez / jnp.sum(ez, axis=-1, keepdims=True)


# ------------------------- wrapper: operand preparation ----------------------
def _prepare_operands(params):
    """Wrapper-side (free) layout work: fuse QKV, fold 1/sqrt(HD) into Q,
    stack per-layer weights on a leading L axis, bf16-cast MXU operands,
    lane-pad the classifier to 128 columns. No per-batch / per-head replication."""
    scale = 1.0 / math.sqrt(HEAD_DIM)

    keys = ("wqkv", "bqkv", "wo", "bo", "g1", "be1",
            "w1", "b1", "w2", "b2", "g2", "be2")
    acc = {k: [] for k in keys}
    for lp in params["layers"]:
        acc["wqkv"].append(jnp.concatenate(
            [lp["wq"] * scale, lp["wk"], lp["wv"]], axis=1))     # (H, 3H)
        acc["bqkv"].append(jnp.concatenate(
            [lp["bq"] * scale, lp["bk"], lp["bv"]], axis=1))     # (1, 3H)
        acc["wo"].append(lp["wo"]); acc["bo"].append(lp["bo"])
        acc["g1"].append(lp["ln1_g"]); acc["be1"].append(lp["ln1_b"])
        acc["w1"].append(lp["w1"]);    acc["b1"].append(lp["b1"])
        acc["w2"].append(lp["w2"]);    acc["b2"].append(lp["b2"])
        acc["g2"].append(lp["ln2_g"]); acc["be2"].append(lp["ln2_b"])

    st = lambda xs: jnp.stack(xs, axis=0)
    bf = lambda a: a.astype(jnp.bfloat16)

    cls_w = jnp.zeros((HIDDEN, NUM_OUT_PAD), jnp.float32)
    cls_w = cls_w.at[:, :NUM_OUT].set(params["cls_w"])
    cls_b = jnp.full((1, NUM_OUT_PAD), NEG_PAD, jnp.float32)
    cls_b = cls_b.at[:, :NUM_OUT].set(params["cls_b"])

    return [
        params["emb_ln_g"].reshape(1, HIDDEN),
        params["emb_ln_b"].reshape(1, HIDDEN),
        bf(st(acc["wqkv"])), st(acc["bqkv"]),
        bf(st(acc["wo"])), st(acc["bo"]),
        st(acc["g1"]), st(acc["be1"]),
        bf(st(acc["w1"])), st(acc["b1"]),
        bf(st(acc["w2"])), st(acc["b2"]),
        st(acc["g2"]), st(acc["be2"]),
        bf(cls_w), cls_b,
    ]


def _embed_sum(params, token_ids):
    # TODO(synk): HF AutoTokenizer / pretrained checkpoint have no Pallas
    # equivalent; integer token ids + deterministic weights are used, and the
    # embedding gather stays in plain JAX. Only type-0 segment embeddings.
    B, S = token_ids.shape
    we = params["word_emb"][token_ids]               # (B, S, H) gather
    pe = params["pos_emb"][:S][None, :, :]
    te = params["type_emb"][0][None, None, :]
    return we + pe + te                              # (B, S, H) f32


@functools.partial(jax.jit, static_argnames=("return_cls_representation",))
def bert_forward(params, token_ids, return_cls_representation=False):
    B, S = token_ids.shape
    x = _embed_sum(params, token_ids)                # (B, S, H) f32
    operands = _prepare_operands(params)

    shared2 = lambda shape: pl.BlockSpec(shape, lambda b, l: (0, 0))
    perlay = lambda d1, d2: pl.BlockSpec((None, d1, d2), lambda b, l: (l, 0, 0))

    in_specs = [
        pl.BlockSpec((None, S, HIDDEN), lambda b, l: (b, 0, 0)),   # x (per batch elem)
        shared2((1, HIDDEN)), shared2((1, HIDDEN)),                # emb LN g, b
        perlay(HIDDEN, 3 * HIDDEN), perlay(1, 3 * HIDDEN),         # wqkv, bqkv
        perlay(HIDDEN, HIDDEN),     perlay(1, HIDDEN),             # wo, bo
        perlay(1, HIDDEN),          perlay(1, HIDDEN),             # ln1 g, b
        perlay(HIDDEN, INTERMEDIATE), perlay(1, INTERMEDIATE),     # w1, b1
        perlay(INTERMEDIATE, HIDDEN), perlay(1, HIDDEN),           # w2, b2
        perlay(1, HIDDEN),          perlay(1, HIDDEN),             # ln2 g, b
        shared2((HIDDEN, NUM_OUT_PAD)), shared2((1, NUM_OUT_PAD)), # classifier
    ]
    out_specs = (
        pl.BlockSpec((None, 1, HIDDEN_PAD), lambda b, l: (b, 0, 0)),
        pl.BlockSpec((None, 1, NUM_OUT_PAD), lambda b, l: (b, 0, 0)),
    )

    hid, probs = pl.pallas_call(
        bert_fused_kernel,
        out_shape=(
            jax.ShapeDtypeStruct((B, 1, HIDDEN_PAD), jnp.float32),
            jax.ShapeDtypeStruct((B, 1, NUM_OUT_PAD), jnp.float32),
        ),
        grid_spec=pltpu.PrefetchScalarGridSpec(
            num_scalar_prefetch=0,
            grid=(B, NUM_LAYERS),                     # batch parallel, layers streamed
            in_specs=in_specs,
            out_specs=out_specs,
            scratch_shapes=[pltpu.VMEM((S, HIDDEN), jnp.float32)],
        ),
        compiler_params=pltpu.CompilerParams(
            dimension_semantics=("parallel", "arbitrary"),
            vmem_limit_bytes=32 * 1024 * 1024,
        ),
    )(x, *operands)

    if return_cls_representation:
        return hid.reshape(B, HIDDEN_PAD)[:, :HIDDEN]
    return probs.reshape(B, NUM_OUT_PAD)[:, :NUM_OUT]


# ----------------------------- deterministic init ----------------------------
def init_params(key):
    keys = iter(jax.random.split(key, 64))

    def nrm(shape):
        return 0.02 * jax.random.normal(next(keys), shape, jnp.float32)

    params = {
        "word_emb": nrm((VOCAB, HIDDEN)),
        "pos_emb": nrm((SEQ, HIDDEN)),
        "type_emb": nrm((2, HIDDEN)),
        "emb_ln_g": jnp.ones((HIDDEN,), jnp.float32),
        "emb_ln_b": jnp.zeros((HIDDEN,), jnp.float32),
        "cls_w": nrm((HIDDEN, NUM_OUT)),
        "cls_b": jnp.zeros((1, NUM_OUT), jnp.float32),
        "layers": [],
    }
    for _ in range(NUM_LAYERS):
        layer = {
            "wq": nrm((HIDDEN, HIDDEN)), "bq": jnp.zeros((1, HIDDEN), jnp.float32),
            "wk": nrm((HIDDEN, HIDDEN)), "bk": jnp.zeros((1, HIDDEN), jnp.float32),
            "wv": nrm((HIDDEN, HIDDEN)), "bv": jnp.zeros((1, HIDDEN), jnp.float32),
            "wo": nrm((HIDDEN, HIDDEN)), "bo": jnp.zeros((1, HIDDEN), jnp.float32),
            "ln1_g": jnp.ones((1, HIDDEN), jnp.float32),
            "ln1_b": jnp.zeros((1, HIDDEN), jnp.float32),
            "w1": nrm((HIDDEN, INTERMEDIATE)),
            "b1": jnp.zeros((1, INTERMEDIATE), jnp.float32),
            "w2": nrm((INTERMEDIATE, HIDDEN)),
            "b2": jnp.zeros((1, HIDDEN), jnp.float32),
            "ln2_g": jnp.ones((1, HIDDEN), jnp.float32),
            "ln2_b": jnp.zeros((1, HIDDEN), jnp.float32),
        }
        params["layers"].append(layer)
    return params


if __name__ == "__main__":
    key = jax.random.PRNGKey(0)
    pkey, dkey = jax.random.split(key)
    params = init_params(pkey)

    batch = 2
    token_ids = jax.random.randint(dkey, (batch, SEQ), 0, VOCAB)

    probs = jax.block_until_ready(bert_forward(params, token_ids))
    assert probs.shape == (batch, NUM_OUT)
    # softmax rows must sum to 1 (padded logit columns contribute exactly 0)
    assert bool(jnp.allclose(probs.sum(axis=1), 1.0, atol=1e-4))
    assert bool(jnp.all(jnp.isfinite(probs)))

    cls_rep = jax.block_until_ready(
        bert_forward(params, token_ids, return_cls_representation=True))
    assert cls_rep.shape == (batch, HIDDEN)
    assert bool(jnp.all(jnp.isfinite(cls_rep)))

    print("KERNEL_OK")
</pallas_src>

<mosaic_0001>
module attributes {stable_mosaic.version = 11 : i64} {
  func.func @bert_fused_kernel(%arg0: i32, %arg1: i32, %arg2: memref<1x8x32xf32, #tpu.memory_space<vmem>>, %arg3: memref<1x32xf32, #tpu.memory_space<vmem>>, %arg4: memref<1x32xf32, #tpu.memory_space<vmem>>, %arg5: memref<1x32x96xbf16, #tpu.memory_space<vmem>>, %arg6: memref<1x1x96xf32, #tpu.memory_space<vmem>>, %arg7: memref<1x32x32xbf16, #tpu.memory_space<vmem>>, %arg8: memref<1x1x32xf32, #tpu.memory_space<vmem>>, %arg9: memref<1x1x32xf32, #tpu.memory_space<vmem>>, %arg10: memref<1x1x32xf32, #tpu.memory_space<vmem>>, %arg11: memref<1x32x64xbf16, #tpu.memory_space<vmem>>, %arg12: memref<1x1x64xf32, #tpu.memory_space<vmem>>, %arg13: memref<1x64x32xbf16, #tpu.memory_space<vmem>>, %arg14: memref<1x1x32xf32, #tpu.memory_space<vmem>>, %arg15: memref<1x1x32xf32, #tpu.memory_space<vmem>>, %arg16: memref<1x1x32xf32, #tpu.memory_space<vmem>>, %arg17: memref<32x128xbf16, #tpu.memory_space<vmem>>, %arg18: memref<1x128xf32, #tpu.memory_space<vmem>>, %arg19: memref<1x1x128xf32, #tpu.memory_space<vmem>>, %arg20: memref<1x1x128xf32, #tpu.memory_space<vmem>>, %arg21: memref<8x32xf32, #tpu.memory_space<vmem>>) attributes {dimension_semantics = [#tpu.dimension_semantics<parallel>, #tpu.dimension_semantics<arbitrary>], iteration_bounds = array<i64: 2, 2>, scalar_prefetch = 0 : i64, scratch_operands = 1 : i64, tpu.core_type = #tpu.core_type<tc>, window_params = [{transform_indices = @transform_0, window_bounds = array<i64: 1, 8, 32>}, {pipeline_mode = #tpu.pipeline_mode<synchronous>, transform_indices = @transform_1, window_bounds = array<i64: 1, 32>}, {pipeline_mode = #tpu.pipeline_mode<synchronous>, transform_indices = @transform_2, window_bounds = array<i64: 1, 32>}, {transform_indices = @transform_3, window_bounds = array<i64: 1, 32, 96>}, {transform_indices = @transform_4, window_bounds = array<i64: 1, 1, 96>}, {transform_indices = @transform_5, window_bounds = array<i64: 1, 32, 32>}, {transform_indices = @transform_6, window_bounds = array<i64: 1, 1, 32>}, {transform_indices = @transform_7, window_bounds = array<i64: 1, 1, 32>}, {transform_indices = @transform_8, window_bounds = array<i64: 1, 1, 32>}, {transform_indices = @transform_9, window_bounds = array<i64: 1, 32, 64>}, {transform_indices = @transform_10, window_bounds = array<i64: 1, 1, 64>}, {transform_indices = @transform_11, window_bounds = array<i64: 1, 64, 32>}, {transform_indices = @transform_12, window_bounds = array<i64: 1, 1, 32>}, {transform_indices = @transform_13, window_bounds = array<i64: 1, 1, 32>}, {transform_indices = @transform_14, window_bounds = array<i64: 1, 1, 32>}, {pipeline_mode = #tpu.pipeline_mode<synchronous>, transform_indices = @transform_15, window_bounds = array<i64: 32, 128>}, {pipeline_mode = #tpu.pipeline_mode<synchronous>, transform_indices = @transform_16, window_bounds = array<i64: 1, 128>}, {transform_indices = @transform_17, window_bounds = array<i64: 1, 1, 128>}, {transform_indices = @transform_18, window_bounds = array<i64: 1, 1, 128>}]} {
    %c0_i32 = arith.constant 0 : i32
    %0 = arith.cmpi eq, %arg1, %c0_i32 : i32
    %1 = arith.extui %0 : i1 to i32
    %c0_i32_0 = arith.constant 0 : i32
    %2 = arith.cmpi ne, %1, %c0_i32_0 : i32
    scf.if %2 {
      %c0_62 = arith.constant 0 : index
      %c0_63 = arith.constant 0 : index
      %c0_64 = arith.constant 0 : index
      %162 = vector.load %arg2[%c0_62, %c0_63, %c0_64] : memref<1x8x32xf32, #tpu.memory_space<vmem>>, vector<1x8x32xf32>
      %163 = vector.shape_cast %162 : vector<1x8x32xf32> to vector<8x32xf32>
      %c0_65 = arith.constant 0 : index
      %c0_66 = arith.constant 0 : index
      %164 = vector.load %arg3[%c0_65, %c0_66] : memref<1x32xf32, #tpu.memory_space<vmem>>, vector<1x32xf32>
      %c0_67 = arith.constant 0 : index
      %c0_68 = arith.constant 0 : index
      %165 = vector.load %arg4[%c0_67, %c0_68] : memref<1x32xf32, #tpu.memory_space<vmem>>, vector<1x32xf32>
      %cst_69 = arith.constant dense<0.000000e+00> : vector<8xf32>
      %166 = vector.multi_reduction <add>, %163, %cst_69 [1] : vector<8x32xf32> to vector<8xf32>
      %167 = vector.shape_cast %166 : vector<8xf32> to vector<8x1xf32>
      %cst_70 = arith.constant 3.200000e+01 : f32
      %168 = vector.broadcast %cst_70 : f32 to vector<8x1xf32>
      %169 = arith.divf %167, %168 : vector<8x1xf32>
      %170 = vector.broadcast %169 : vector<8x1xf32> to vector<8x32xf32>
      %171 = arith.subf %163, %170 : vector<8x32xf32>
      %172 = arith.mulf %171, %171 : vector<8x32xf32>
      %cst_71 = arith.constant dense<0.000000e+00> : vector<8xf32>
      %173 = vector.multi_reduction <add>, %172, %cst_71 [1] : vector<8x32xf32> to vector<8xf32>
      %174 = vector.shape_cast %173 : vector<8xf32> to vector<8x1xf32>
      %cst_72 = arith.constant 3.200000e+01 : f32
      %175 = vector.broadcast %cst_72 : f32 to vector<8x1xf32>
      %176 = arith.divf %174, %175 : vector<8x1xf32>
      %177 = vector.broadcast %169 : vector<8x1xf32> to vector<8x32xf32>
      %178 = arith.subf %163, %177 : vector<8x32xf32>
      %cst_73 = arith.constant 9.99999996E-13 : f32
      %179 = vector.broadcast %cst_73 : f32 to vector<8x1xf32>
      %180 = arith.addf %176, %179 : vector<8x1xf32>
      %181 = math.rsqrt %180 : vector<8x1xf32>
      %182 = vector.broadcast %181 : vector<8x1xf32> to vector<8x32xf32>
      %183 = arith.mulf %178, %182 : vector<8x32xf32>
      %184 = vector.broadcast %164 : vector<1x32xf32> to vector<8x32xf32>
      %185 = arith.mulf %183, %184 : vector<8x32xf32>
      %186 = vector.broadcast %165 : vector<1x32xf32> to vector<8x32xf32>
      %187 = arith.addf %185, %186 : vector<8x32xf32>
      %c0_74 = arith.constant 0 : index
      %c0_75 = arith.constant 0 : index
      %188 = vector.load %arg21[%c0_74, %c0_75] : memref<8x32xf32, #tpu.memory_space<vmem>>, vector<8x32xf32>
      tpu.vector_store %arg21[%c0_74, %c0_75], %187 {strides = array<i32>} : memref<8x32xf32, #tpu.memory_space<vmem>>, vector<8x32xf32>,
    } else {
    }
    %c0 = arith.constant 0 : index
    %c0_1 = arith.constant 0 : index
    %3 = vector.load %arg21[%c0, %c0_1] : memref<8x32xf32, #tpu.memory_space<vmem>>, vector<8x32xf32>
    %4 = arith.truncf %3 : vector<8x32xf32> to vector<8x32xbf16>
    %c0_2 = arith.constant 0 : index
    %c0_3 = arith.constant 0 : index
    %c0_4 = arith.constant 0 : index
    %5 = vector.load %arg5[%c0_2, %c0_3, %c0_4] : memref<1x32x96xbf16, #tpu.memory_space<vmem>>, vector<1x32x96xbf16>
    %6 = vector.shape_cast %5 : vector<1x32x96xbf16> to vector<32x96xbf16>
    %cst = arith.constant dense<0.000000e+00> : vector<8x96xf32>
    %7 = tpu.matmul %4, %6, %cst {dimension_numbers = #tpu.dot_dimension_numbers<[1], [0], [0], [1], [0, 0, 1, 1], [], []>} : vector<8x32xbf16>, vector<32x96xbf16>, vector<8x96xf32> -> vector<8x96xf32>
    %c0_5 = arith.constant 0 : index
    %c0_6 = arith.constant 0 : index
    %c0_7 = arith.constant 0 : index
    %8 = vector.load %arg6[%c0_5, %c0_6, %c0_7] : memref<1x1x96xf32, #tpu.memory_space<vmem>>, vector<1x1x96xf32>
    %9 = vector.shape_cast %8 : vector<1x1x96xf32> to vector<1x96xf32>
    %10 = vector.broadcast %9 : vector<1x96xf32> to vector<8x96xf32>
    %11 = arith.addf %7, %10 : vector<8x96xf32>
    %12 = vector.extract_strided_slice %11 {offsets = [0, 0], sizes = [8, 32], strides = [1, 1]} : vector<8x96xf32> to vector<8x32xf32>
    %13 = vector.extract_strided_slice %12 {offsets = [0, 0], sizes = [8, 8], strides = [1, 1]} : vector<8x32xf32> to vector<8x8xf32>
    %14 = vector.extract_strided_slice %12 {offsets = [0, 8], sizes = [8, 8], strides = [1, 1]} : vector<8x32xf32> to vector<8x8xf32>
    %15 = vector.extract_strided_slice %12 {offsets = [0, 16], sizes = [8, 8], strides = [1, 1]} : vector<8x32xf32> to vector<8x8xf32>
    %16 = vector.extract_strided_slice %12 {offsets = [0, 24], sizes = [8, 8], strides = [1, 1]} : vector<8x32xf32> to vector<8x8xf32>
    %17 = vector.shape_cast %13 : vector<8x8xf32> to vector<1x8x8xf32>
    %18 = vector.shape_cast %14 : vector<8x8xf32> to vector<1x8x8xf32>
    %19 = vector.shape_cast %15 : vector<8x8xf32> to vector<1x8x8xf32>
    %20 = vector.shape_cast %16 : vector<8x8xf32> to vector<1x8x8xf32>
    %21 = tpu.concatenate %17, %18, %19, %20 in 0 : vector<1x8x8xf32>, vector<1x8x8xf32>, vector<1x8x8xf32>, vector<1x8x8xf32> -> vector<4x8x8xf32>
    %22 = arith.truncf %21 : vector<4x8x8xf32> to vector<4x8x8xbf16>
    %23 = vector.extract_strided_slice %11 {offsets = [0, 32], sizes = [8, 32], strides = [1, 1]} : vector<8x96xf32> to vector<8x32xf32>
    %24 = vector.extract_strided_slice %23 {offsets = [0, 0], sizes = [8, 8], strides = [1, 1]} : vector<8x32xf32> to vector<8x8xf32>
    %25 = vector.extract_strided_slice %23 {offsets = [0, 8], sizes = [8, 8], strides = [1, 1]} : vector<8x32xf32> to vector<8x8xf32>
    %26 = vector.extract_strided_slice %23 {offsets = [0, 16], sizes = [8, 8], strides = [1, 1]} : vector<8x32xf32> to vector<8x8xf32>
    %27 = vector.extract_strided_slice %23 {offsets = [0, 24], sizes = [8, 8], strides = [1, 1]} : vector<8x32xf32> to vector<8x8xf32>
    %28 = vector.shape_cast %24 : vector<8x8xf32> to vector<1x8x8xf32>
    %29 = vector.shape_cast %25 : vector<8x8xf32> to vector<1x8x8xf32>
    %30 = vector.shape_cast %26 : vector<8x8xf32> to vector<1x8x8xf32>
    %31 = vector.shape_cast %27 : vector<8x8xf32> to vector<1x8x8xf32>
    %32 = tpu.concatenate %28, %29, %30, %31 in 0 : vector<1x8x8xf32>, vector<1x8x8xf32>, vector<1x8x8xf32>, vector<1x8x8xf32> -> vector<4x8x8xf32>
    %33 = arith.truncf %32 : vector<4x8x8xf32> to vector<4x8x8xbf16>
    %34 = vector.extract_strided_slice %11 {offsets = [0, 64], sizes = [8, 32], strides = [1, 1]} : vector<8x96xf32> to vector<8x32xf32>
    %35 = vector.extract_strided_slice %34 {offsets = [0, 0], sizes = [8, 8], strides = [1, 1]} : vector<8x32xf32> to vector<8x8xf32>
    %36 = vector.extract_strided_slice %34 {offsets = [0, 8], sizes = [8, 8], strides = [1, 1]} : vector<8x32xf32> to vector<8x8xf32>
    %37 = vector.extract_strided_slice %34 {offsets = [0, 16], sizes = [8, 8], strides = [1, 1]} : vector<8x32xf32> to vector<8x8xf32>
    %38 = vector.extract_strided_slice %34 {offsets = [0, 24], sizes = [8, 8], strides = [1, 1]} : vector<8x32xf32> to vector<8x8xf32>
    %39 = vector.shape_cast %35 : vector<8x8xf32> to vector<1x8x8xf32>
    %40 = vector.shape_cast %36 : vector<8x8xf32> to vector<1x8x8xf32>
    %41 = vector.shape_cast %37 : vector<8x8xf32> to vector<1x8x8xf32>
    %42 = vector.shape_cast %38 : vector<8x8xf32> to vector<1x8x8xf32>
    %43 = tpu.concatenate %39, %40, %41, %42 in 0 : vector<1x8x8xf32>, vector<1x8x8xf32>, vector<1x8x8xf32>, vector<1x8x8xf32> -> vector<4x8x8xf32>
    %44 = arith.truncf %43 : vector<4x8x8xf32> to vector<4x8x8xbf16>
    "tpu.trace_start"() <{level = 10 : i32, message = "nqd,nkd->nqk"}> : () -> ()
    %cst_8 = arith.constant dense<0.000000e+00> : vector<4x8x8xf32>
    %45 = tpu.matmul %22, %33, %cst_8 {dimension_numbers = #tpu.dot_dimension_numbers<[2], [2], [1], [1], [0, 0, 0, 1, 1, 1], [0], [0]>} : vector<4x8x8xbf16>, vector<4x8x8xbf16>, vector<4x8x8xf32> -> vector<4x8x8xf32>
    "tpu.trace_stop"() : () -> ()
    %cst_9 = arith.constant dense<0xFF800000> : vector<4x8xf32>
    %46 = vector.multi_reduction <maximumf>, %45, %cst_9 [2] : vector<4x8x8xf32> to vector<4x8xf32>
    %47 = vector.shape_cast %46 : vector<4x8xf32> to vector<4x8x1xf32>
    %48 = vector.broadcast %47 : vector<4x8x1xf32> to vector<4x8x8xf32>
    %49 = arith.subf %45, %48 : vector<4x8x8xf32>
    %50 = math.exp %49 : vector<4x8x8xf32>
    %cst_10 = arith.constant dense<0.000000e+00> : vector<4x8xf32>
    %51 = vector.multi_reduction <add>, %50, %cst_10 [2] : vector<4x8x8xf32> to vector<4x8xf32>
    %52 = vector.shape_cast %51 : vector<4x8xf32> to vector<4x8x1xf32>
    %53 = tpu.reciprocal %52 {approx = true} : vector<4x8x1xf32> -> vector<4x8x1xf32>
    %54 = vector.broadcast %53 : vector<4x8x1xf32> to vector<4x8x8xf32>
    %55 = arith.mulf %50, %54 : vector<4x8x8xf32>
    %56 = arith.truncf %55 : vector<4x8x8xf32> to vector<4x8x8xbf16>
    "tpu.trace_start"() <{level = 10 : i32, message = "nqk,nkd->nqd"}> : () -> ()
    %cst_11 = arith.constant dense<0.000000e+00> : vector<4x8x8xf32>
    %57 = tpu.matmul %56, %44, %cst_11 {dimension_numbers = #tpu.dot_dimension_numbers<[2], [1], [1], [2], [0, 0, 0, 1, 1, 2], [0], [0]>} : vector<4x8x8xbf16>, vector<4x8x8xbf16>, vector<4x8x8xf32> -> vector<4x8x8xf32>
    "tpu.trace_stop"() : () -> ()
    %58 = vector.extract_strided_slice %57 {offsets = [0, 0, 0], sizes = [1, 8, 8], strides = [1, 1, 1]} : vector<4x8x8xf32> to vector<1x8x8xf32>
    %59 = vector.shape_cast %58 : vector<1x8x8xf32> to vector<8x8xf32>
    %60 = vector.extract_strided_slice %57 {offsets = [1, 0, 0], sizes = [1, 8, 8], strides = [1, 1, 1]} : vector<4x8x8xf32> to vector<1x8x8xf32>
    %61 = vector.shape_cast %60 : vector<1x8x8xf32> to vector<8x8xf32>
    %62 = vector.extract_strided_slice %57 {offsets = [2, 0, 0], sizes = [1, 8, 8], strides = [1, 1, 1]} : vector<4x8x8xf32> to vector<1x8x8xf32>
    %63 = vector.shape_cast %62 : vector<1x8x8xf32> to vector<8x8xf32>
    %64 = vector.extract_strided_slice %57 {offsets = [3, 0, 0], sizes = [1, 8, 8], strides = [1, 1, 1]} : vector<4x8x8xf32> to vector<1x8x8xf32>
    %65 = vector.shape_cast %64 : vector<1x8x8xf32> to vector<8x8xf32>
    %66 = tpu.concatenate %59, %61, %63, %65 in 1 : vector<8x8xf32>, vector<8x8xf32>, vector<8x8xf32>, vector<8x8xf32> -> vector<8x32xf32>
    %67 = arith.truncf %66 : vector<8x32xf32> to vector<8x32xbf16>
    %c0_12 = arith.constant 0 : index
    %c0_13 = arith.constant 0 : index
    %c0_14 = arith.constant 0 : index
    %68 = vector.load %arg7[%c0_12, %c0_13, %c0_14] : memref<1x32x32xbf16, #tpu.memory_space<vmem>>, vector<1x32x32xbf16>
    %69 = vector.shape_cast %68 : vector<1x32x32xbf16> to vector<32x32xbf16>
    %cst_15 = arith.constant dense<0.000000e+00> : vector<8x32xf32>
    %70 = tpu.matmul %67, %69, %cst_15 {dimension_numbers = #tpu.dot_dimension_numbers<[1], [0], [0], [1], [0, 0, 1, 1], [], []>} : vector<8x32xbf16>, vector<32x32xbf16>, vector<8x32xf32> -> vector<8x32xf32>
    %c0_16 = arith.constant 0 : index
    %c0_17 = arith.constant 0 : index
    %c0_18 = arith.constant 0 : index
    %71 = vector.load %arg8[%c0_16, %c0_17, %c0_18] : memref<1x1x32xf32, #tpu.memory_space<vmem>>, vector<1x1x32xf32>
    %72 = vector.shape_cast %71 : vector<1x1x32xf32> to vector<1x32xf32>
    %73 = vector.broadcast %72 : vector<1x32xf32> to vector<8x32xf32>
    %74 = arith.addf %70, %73 : vector<8x32xf32>
    %75 = arith.addf %3, %74 : vector<8x32xf32>
    %c0_19 = arith.constant 0 : index
    %c0_20 = arith.constant 0 : index
    %c0_21 = arith.constant 0 : index
    %76 = vector.load %arg9[%c0_19, %c0_20, %c0_21] : memref<1x1x32xf32, #tpu.memory_space<vmem>>, vector<1x1x32xf32>
    %77 = vector.shape_cast %76 : vector<1x1x32xf32> to vector<1x32xf32>
    %c0_22 = arith.constant 0 : index
    %c0_23 = arith.constant 0 : index
    %c0_24 = arith.constant 0 : index
    %78 = vector.load %arg10[%c0_22, %c0_23, %c0_24] : memref<1x1x32xf32, #tpu.memory_space<vmem>>, vector<1x1x32xf32>
    %79 = vector.shape_cast %78 : vector<1x1x32xf32> to vector<1x32xf32>
    %cst_25 = arith.constant dense<0.000000e+00> : vector<8xf32>
    %80 = vector.multi_reduction <add>, %75, %cst_25 [1] : vector<8x32xf32> to vector<8xf32>
    %81 = vector.shape_cast %80 : vector<8xf32> to vector<8x1xf32>
    %cst_26 = arith.constant 3.200000e+01 : f32
    %82 = vector.broadcast %cst_26 : f32 to vector<8x1xf32>
    %83 = arith.divf %81, %82 : vector<8x1xf32>
    %84 = vector.broadcast %83 : vector<8x1xf32> to vector<8x32xf32>
    %85 = arith.subf %75, %84 : vector<8x32xf32>
    %86 = arith.mulf %85, %85 : vector<8x32xf32>
    %cst_27 = arith.constant dense<0.000000e+00> : vector<8xf32>
    %87 = vector.multi_reduction <add>, %86, %cst_27 [1] : vector<8x32xf32> to vector<8xf32>
    %88 = vector.shape_cast %87 : vector<8xf32> to vector<8x1xf32>
    %cst_28 = arith.constant 3.200000e+01 : f32
    %89 = vector.broadcast %cst_28 : f32 to vector<8x1xf32>
    %90 = arith.divf %88, %89 : vector<8x1xf32>
    %91 = vector.broadcast %83 : vector<8x1xf32> to vector<8x32xf32>
    %92 = arith.subf %75, %91 : vector<8x32xf32>
    %cst_29 = arith.constant 9.99999996E-13 : f32
    %93 = vector.broadcast %cst_29 : f32 to vector<8x1xf32>
    %94 = arith.addf %90, %93 : vector<8x1xf32>
    %95 = math.rsqrt %94 : vector<8x1xf32>
    %96 = vector.broadcast %95 : vector<8x1xf32> to vector<8x32xf32>
    %97 = arith.mulf %92, %96 : vector<8x32xf32>
    %98 = vector.broadcast %77 : vector<1x32xf32> to vector<8x32xf32>
    %99 = arith.mulf %97, %98 : vector<8x32xf32>
    %100 = vector.broadcast %79 : vector<1x32xf32> to vector<8x32xf32>
    %101 = arith.addf %99, %100 : vector<8x32xf32>
    %102 = arith.truncf %101 : vector<8x32xf32> to vector<8x32xbf16>
    %c0_30 = arith.constant 0 : index
    %c0_31 = arith.constant 0 : index
    %c0_32 = arith.constant 0 : index
    %103 = vector.load %arg11[%c0_30, %c0_31, %c0_32] : memref<1x32x64xbf16, #tpu.memory_space<vmem>>, vector<1x32x64xbf16>
    %104 = vector.shape_cast %103 : vector<1x32x64xbf16> to vector<32x64xbf16>
    %cst_33 = arith.constant dense<0.000000e+00> : vector<8x64xf32>
    %105 = tpu.matmul %102, %104, %cst_33 {dimension_numbers = #tpu.dot_dimension_numbers<[1], [0], [0], [1], [0, 0, 1, 1], [], []>} : vector<8x32xbf16>, vector<32x64xbf16>, vector<8x64xf32> -> vector<8x64xf32>
    %c0_34 = arith.constant 0 : index
    %c0_35 = arith.constant 0 : index
    %c0_36 = arith.constant 0 : index
    %106 = vector.load %arg12[%c0_34, %c0_35, %c0_36] : memref<1x1x64xf32, #tpu.memory_space<vmem>>, vector<1x1x64xf32>
    %107 = vector.shape_cast %106 : vector<1x1x64xf32> to vector<1x64xf32>
    %108 = vector.broadcast %107 : vector<1x64xf32> to vector<8x64xf32>
    %109 = arith.addf %105, %108 : vector<8x64xf32>
    %cst_37 = arith.constant 5.000000e-01 : f32
    %110 = vector.broadcast %cst_37 : f32 to vector<8x64xf32>
    %111 = arith.mulf %110, %109 : vector<8x64xf32>
    %cst_38 = arith.constant 4.471500e-02 : f32
    %112 = vector.broadcast %cst_38 : f32 to vector<8x64xf32>
    %113 = arith.mulf %112, %109 : vector<8x64xf32>
    %114 = arith.mulf %113, %109 : vector<8x64xf32>
    %115 = arith.mulf %114, %109 : vector<8x64xf32>
    %116 = arith.addf %109, %115 : vector<8x64xf32>
    %cst_39 = arith.constant 0.797884583 : f32
    %117 = vector.broadcast %cst_39 : f32 to vector<8x64xf32>
    %118 = arith.mulf %117, %116 : vector<8x64xf32>
    %119 = math.tanh %118 : vector<8x64xf32>
    %cst_40 = arith.constant 1.000000e+00 : f32
    %120 = vector.broadcast %cst_40 : f32 to vector<8x64xf32>
    %121 = arith.addf %120, %119 : vector<8x64xf32>
    %122 = arith.mulf %111, %121 : vector<8x64xf32>
    %123 = arith.truncf %122 : vector<8x64xf32> to vector<8x64xbf16>
    %c0_41 = arith.constant 0 : index
    %c0_42 = arith.constant 0 : index
    %c0_43 = arith.constant 0 : index
    %124 = vector.load %arg13[%c0_41, %c0_42, %c0_43] : memref<1x64x32xbf16, #tpu.memory_space<vmem>>, vector<1x64x32xbf16>
    %125 = vector.shape_cast %124 : vector<1x64x32xbf16> to vector<64x32xbf16>
    %cst_44 = arith.constant dense<0.000000e+00> : vector<8x32xf32>
    %126 = tpu.matmul %123, %125, %cst_44 {dimension_numbers = #tpu.dot_dimension_numbers<[1], [0], [0], [1], [0, 0, 1, 1], [], []>} : vector<8x64xbf16>, vector<64x32xbf16>, vector<8x32xf32> -> vector<8x32xf32>
    %c0_45 = arith.constant 0 : index
    %c0_46 = arith.constant 0 : index
    %c0_47 = arith.constant 0 : index
    %127 = vector.load %arg14[%c0_45, %c0_46, %c0_47] : memref<1x1x32xf32, #tpu.memory_space<vmem>>, vector<1x1x32xf32>
    %128 = vector.shape_cast %127 : vector<1x1x32xf32> to vector<1x32xf32>
    %129 = vector.broadcast %128 : vector<1x32xf32> to vector<8x32xf32>
    %130 = arith.addf %126, %129 : vector<8x32xf32>
    %131 = arith.addf %101, %130 : vector<8x32xf32>
    %c0_48 = arith.constant 0 : index
    %c0_49 = arith.constant 0 : index
    %c0_50 = arith.constant 0 : index
    %132 = vector.load %arg15[%c0_48, %c0_49, %c0_50] : memref<1x1x32xf32, #tpu.memory_space<vmem>>, vector<1x1x32xf32>
    %133 = vector.shape_cast %132 : vector<1x1x32xf32> to vector<1x32xf32>
    %c0_51 = arith.constant 0 : index
    %c0_52 = arith.constant 0 : index
    %c0_53 = arith.constant 0 : index
    %134 = vector.load %arg16[%c0_51, %c0_52, %c0_53] : memref<1x1x32xf32, #tpu.memory_space<vmem>>, vector<1x1x32xf32>
    %135 = vector.shape_cast %134 : vector<1x1x32xf32> to vector<1x32xf32>
    %cst_54 = arith.constant dense<0.000000e+00> : vector<8xf32>
    %136 = vector.multi_reduction <add>, %131, %cst_54 [1] : vector<8x32xf32> to vector<8xf32>
    %137 = vector.shape_cast %136 : vector<8xf32> to vector<8x1xf32>
    %cst_55 = arith.constant 3.200000e+01 : f32
    %138 = vector.broadcast %cst_55 : f32 to vector<8x1xf32>
    %139 = arith.divf %137, %138 : vector<8x1xf32>
    %140 = vector.broadcast %139 : vector<8x1xf32> to vector<8x32xf32>
    %141 = arith.subf %131, %140 : vector<8x32xf32>
    %142 = arith.mulf %141, %141 : vector<8x32xf32>
    %cst_56 = arith.constant dense<0.000000e+00> : vector<8xf32>
    %143 = vector.multi_reduction <add>, %142, %cst_56 [1] : vector<8x32xf32> to vector<8xf32>
    %144 = vector.shape_cast %143 : vector<8xf32> to vector<8x1xf32>
    %cst_57 = arith.constant 3.200000e+01 : f32
    %145 = vector.broadcast %cst_57 : f32 to vector<8x1xf32>
    %146 = arith.divf %144, %145 : vector<8x1xf32>
    %147 = vector.broadcast %139 : vector<8x1xf32> to vector<8x32xf32>
    %148 = arith.subf %131, %147 : vector<8x32xf32>
    %cst_58 = arith.constant 9.99999996E-13 : f32
    %149 = vector.broadcast %cst_58 : f32 to vector<8x1xf32>
    %150 = arith.addf %146, %149 : vector<8x1xf32>
    %151 = math.rsqrt %150 : vector<8x1xf32>
    %152 = vector.broadcast %151 : vector<8x1xf32> to vector<8x32xf32>
    %153 = arith.mulf %148, %152 : vector<8x32xf32>
    %154 = vector.broadcast %133 : vector<1x32xf32> to vector<8x32xf32>
    %155 = arith.mulf %153, %154 : vector<8x32xf32>
    %156 = vector.broadcast %135 : vector<1x32xf32> to vector<8x32xf32>
    %157 = arith.addf %155, %156 : vector<8x32xf32>
    %c0_59 = arith.constant 0 : index
    %c0_60 = arith.constant 0 : index
    %158 = vector.load %arg21[%c0_59, %c0_60] : memref<8x32xf32, #tpu.memory_space<vmem>>, vector<8x32xf32>
    tpu.vector_store %arg21[%c0_59, %c0_60], %157 {strides = array<i32>} : memref<8x32xf32, #tpu.memory_space<vmem>>, vector<8x32xf32>,
    %c1_i32 = arith.constant 1 : i32
    %159 = arith.cmpi eq, %arg1, %c1_i32 : i32
    %160 = arith.extui %159 : i1 to i32
    %c0_i32_61 = arith.constant 0 : i32
    %161 = arith.cmpi ne, %160, %c0_i32_61 : i32
    scf.if %161 {
      %162 = vector.extract_strided_slice %157 {offsets = [0, 0], sizes = [1, 32], strides = [1, 1]} : vector<8x32xf32> to vector<1x32xf32>
      %cst_62 = arith.constant 0.000000e+00 : f32
      %163 = vector.broadcast %cst_62 : f32 to vector<1x96xf32>
      %164 = tpu.concatenate %162, %163 in 1 : vector<1x32xf32>, vector<1x96xf32> -> vector<1x128xf32>
      %c0_63 = arith.constant 0 : index
      %c0_64 = arith.constant 0 : index
      %c0_65 = arith.constant 0 : index
      %165 = vector.load %arg19[%c0_63, %c0_64, %c0_65] : memref<1x1x128xf32, #tpu.memory_space<vmem>>, vector<1x1x128xf32>
      %166 = vector.shape_cast %165 : vector<1x1x128xf32> to vector<1x128xf32>
      %167 = vector.shape_cast %164 : vector<1x128xf32> to vector<1x1x128xf32>
      tpu.vector_store %arg19[%c0_63, %c0_64, %c0_65], %167 {strides = array<i32>} : memref<1x1x128xf32, #tpu.memory_space<vmem>>, vector<1x1x128xf32>,
      %168 = arith.truncf %162 : vector<1x32xf32> to vector<1x32xbf16>
      %c0_66 = arith.constant 0 : index
      %c0_67 = arith.constant 0 : index
      %169 = vector.load %arg17[%c0_66, %c0_67] : memref<32x128xbf16, #tpu.memory_space<vmem>>, vector<32x128xbf16>
      %cst_68 = arith.constant dense<0.000000e+00> : vector<1x128xf32>
      %170 = tpu.matmul %168, %169, %cst_68 {dimension_numbers = #tpu.dot_dimension_numbers<[1], [0], [0], [1], [0, 0, 1, 1], [], []>} : vector<1x32xbf16>, vector<32x128xbf16>, vector<1x128xf32> -> vector<1x128xf32>
      %c0_69 = arith.constant 0 : index
      %c0_70 = arith.constant 0 : index
      %171 = vector.load %arg18[%c0_69, %c0_70] : memref<1x128xf32, #tpu.memory_space<vmem>>, vector<1x128xf32>
      %172 = arith.addf %170, %171 : vector<1x128xf32>
      %cst_71 = arith.constant dense<0xFF800000> : vector<1xf32>
      %173 = vector.multi_reduction <maximumf>, %172, %cst_71 [1] : vector<1x128xf32> to vector<1xf32>
      %174 = vector.shape_cast %173 : vector<1xf32> to vector<1x1xf32>
      %175 = vector.broadcast %174 : vector<1x1xf32> to vector<1x128xf32>
      %176 = arith.subf %172, %175 : vector<1x128xf32>
      %177 = math.exp %176 : vector<1x128xf32>
      %cst_72 = arith.constant dense<0.000000e+00> : vector<1xf32>
      %178 = vector.multi_reduction <add>, %177, %cst_72 [1] : vector<1x128xf32> to vector<1xf32>
      %179 = vector.shape_cast %178 : vector<1xf32> to vector<1x1xf32>
      %180 = vector.broadcast %179 : vector<1x1xf32> to vector<1x128xf32>
      %181 = arith.divf %177, %180 : vector<1x128xf32>
      %c0_73 = arith.constant 0 : index
      %c0_74 = arith.constant 0 : index
      %c0_75 = arith.constant 0 : index
      %182 = vector.load %arg20[%c0_73, %c0_74, %c0_75] : memref<1x1x128xf32, #tpu.memory_space<vmem>>, vector<1x1x128xf32>
      %183 = vector.shape_cast %182 : vector<1x1x128xf32> to vector<1x128xf32>
      %184 = vector.shape_cast %181 : vector<1x128xf32> to vector<1x1x128xf32>
      tpu.vector_store %arg20[%c0_73, %c0_74, %c0_75], %184 {strides = array<i32>} : memref<1x1x128xf32, #tpu.memory_space<vmem>>, vector<1x1x128xf32>,
    } else {
    }
    return
  }
  func.func @transform_0(%arg0: i32, %arg1: i32) -> (i32, i32, i32) {
    %c0_i32 = arith.constant 0 : i32
    %c0_i32_0 = arith.constant 0 : i32
    %c0_i32_1 = arith.constant 0 : i32
    return %arg0, %c0_i32, %c0_i32_0 : i32, i32, i32
  }
  func.func @transform_1(%arg0: i32, %arg1: i32) -> (i32, i32) {
    %c0_i32 = arith.constant 0 : i32
    %c0_i32_0 = arith.constant 0 : i32
    %c0_i32_1 = arith.constant 0 : i32
    return %c0_i32, %c0_i32_0 : i32, i32
  }
  func.func @transform_2(%arg0: i32, %arg1: i32) -> (i32, i32) {
    %c0_i32 = arith.constant 0 : i32
    %c0_i32_0 = arith.constant 0 : i32
    %c0_i32_1 = arith.constant 0 : i32
    return %c0_i32, %c0_i32_0 : i32, i32
  }
  func.func @transform_3(%arg0: i32, %arg1: i32) -> (i32, i32, i32) {
    %c0_i32 = arith.constant 0 : i32
    %c0_i32_0 = arith.constant 0 : i32
    %c0_i32_1 = arith.constant 0 : i32
    return %arg1, %c0_i32, %c0_i32_0 : i32, i32, i32
  }
  func.func @transform_4(%arg0: i32, %arg1: i32) -> (i32, i32, i32) {
    %c0_i32 = arith.constant 0 : i32
    %c0_i32_0 = arith.constant 0 : i32
    %c0_i32_1 = arith.constant 0 : i32
    return %arg1, %c0_i32, %c0_i32_0 : i32, i32, i32
  }
  func.func @transform_5(%arg0: i32, %arg1: i32) -> (i32, i32, i32) {
    %c0_i32 = arith.constant 0 : i32
    %c0_i32_0 = arith.constant 0 : i32
    %c0_i32_1 = arith.constant 0 : i32
    return %arg1, %c0_i32, %c0_i32_0 : i32, i32, i32
  }
  func.func @transform_6(%arg0: i32, %arg1: i32) -> (i32, i32, i32) {
    %c0_i32 = arith.constant 0 : i32
    %c0_i32_0 = arith.constant 0 : i32
    %c0_i32_1 = arith.constant 0 : i32
    return %arg1, %c0_i32, %c0_i32_0 : i32, i32, i32
  }
  func.func @transform_7(%arg0: i32, %arg1: i32) -> (i32, i32, i32) {
    %c0_i32 = arith.constant 0 : i32
    %c0_i32_0 = arith.constant 0 : i32
    %c0_i32_1 = arith.constant 0 : i32
    return %arg1, %c0_i32, %c0_i32_0 : i32, i32, i32
  }
  func.func @transform_8(%arg0: i32, %arg1: i32) -> (i32, i32, i32) {
    %c0_i32 = arith.constant 0 : i32
    %c0_i32_0 = arith.constant 0 : i32
    %c0_i32_1 = arith.constant 0 : i32
    return %arg1, %c0_i32, %c0_i32_0 : i32, i32, i32
  }
  func.func @transform_9(%arg0: i32, %arg1: i32) -> (i32, i32, i32) {
    %c0_i32 = arith.constant 0 : i32
    %c0_i32_0 = arith.constant 0 : i32
    %c0_i32_1 = arith.constant 0 : i32
    return %arg1, %c0_i32, %c0_i32_0 : i32, i32, i32
  }
  func.func @transform_10(%arg0: i32, %arg1: i32) -> (i32, i32, i32) {
    %c0_i32 = arith.constant 0 : i32
    %c0_i32_0 = arith.constant 0 : i32
    %c0_i32_1 = arith.constant 0 : i32
    return %arg1, %c0_i32, %c0_i32_0 : i32, i32, i32
  }
  func.func @transform_11(%arg0: i32, %arg1: i32) -> (i32, i32, i32) {
    %c0_i32 = arith.constant 0 : i32
    %c0_i32_0 = arith.constant 0 : i32
    %c0_i32_1 = arith.constant 0 : i32
    return %arg1, %c0_i32, %c0_i32_0 : i32, i32, i32
  }
  func.func @transform_12(%arg0: i32, %arg1: i32) -> (i32, i32, i32) {
    %c0_i32 = arith.constant 0 : i32
    %c0_i32_0 = arith.constant 0 : i32
    %c0_i32_1 = arith.constant 0 : i32
    return %arg1, %c0_i32, %c0_i32_0 : i32, i32, i32
  }
  func.func @transform_13(%arg0: i32, %arg1: i32) -> (i32, i32, i32) {
    %c0_i32 = arith.constant 0 : i32
    %c0_i32_0 = arith.constant 0 : i32
    %c0_i32_1 = arith.constant 0 : i32
    return %arg1, %c0_i32, %c0_i32_0 : i32, i32, i32
  }
  func.func @transform_14(%arg0: i32, %arg1: i32) -> (i32, i32, i32) {
    %c0_i32 = arith.constant 0 : i32
    %c0_i32_0 = arith.constant 0 : i32
    %c0_i32_1 = arith.constant 0 : i32
    return %arg1, %c0_i32, %c0_i32_0 : i32, i32, i32
  }
  func.func @transform_15(%arg0: i32, %arg1: i32) -> (i32, i32) {
    %c0_i32 = arith.constant 0 : i32
    %c0_i32_0 = arith.constant 0 : i32
    %c0_i32_1 = arith.constant 0 : i32
    return %c0_i32, %c0_i32_0 : i32, i32
  }
  func.func @transform_16(%arg0: i32, %arg1: i32) -> (i32, i32) {
    %c0_i32 = arith.constant 0 : i32
    %c0_i32_0 = arith.constant 0 : i32
    %c0_i32_1 = arith.constant 0 : i32
    return %c0_i32, %c0_i32_0 : i32, i32
  }
  func.func @transform_17(%arg0: i32, %arg1: i32) -> (i32, i32, i32) {
    %c0_i32 = arith.constant 0 : i32
    %c0_i32_0 = arith.constant 0 : i32
    %c0_i32_1 = arith.constant 0 : i32
    return %arg0, %c0_i32, %c0_i32_0 : i32, i32, i32
  }
  func.func @transform_18(%arg0: i32, %arg1: i32) -> (i32, i32, i32) {
    %c0_i32 = arith.constant 0 : i32
    %c0_i32_0 = arith.constant 0 : i32
    %c0_i32_1 = arith.constant 0 : i32
    return %arg0, %c0_i32, %c0_i32_0 : i32, i32, i32
  }
}

</mosaic_0001>

<bundles_post_ra>
// kernel: bert_forward.1
= control target key start
LH: loop header
LB: loop body
LE: loop exit
PB: predicated region body
PF: predicated region fallthrough
CT: control target
= control target key end

     0   :  { %s2917_s0 = inlined_call_operand.vmem [shape: f32[2,8,32], index: 0, kind: input, shape index: {}]   ;;  %s2918_s1 = inlined_call_operand.vmem [shape: f32[1,32], index: 1, kind: input, shape index: {}]   ;;  %s2919_s2 = inlined_call_operand.vmem [shape: f32[1,32], index: 2, kind: input, shape index: {}]   ;;  %s2920_s3 = inlined_call_operand.vmem [shape: bf16[2,32,96], index: 3, kind: input, shape index: {}]   ;;  %s2921_s4 = inlined_call_operand.vmem [shape: f32[2,1,96], index: 4, kind: input, shape index: {}]   ;;  %s2922_s5 = inlined_call_operand.vmem [shape: bf16[2,32,32], index: 5, kind: input, shape index: {}]   ;;  %s2923_s6 = inlined_call_operand.vmem [shape: f32[2,1,32], index: 6, kind: input, shape index: {}]   ;;  %s2924_s7 = inlined_call_operand.vmem [shape: f32[2,1,32], index: 7, kind: input, shape index: {}]   ;;  %s2925_s8 = inlined_call_operand.vmem [shape: f32[2,1,32], index: 8, kind: input, shape index: {}]   ;;  %s2926_s9 = inlined_call_operand.vmem [shape: bf16[2,32,64], index: 9, kind: input, shape index: {}]   ;;  %s2927_s10 = inlined_call_operand.vmem [shape: f32[2,1,64], index: 10, kind: input, shape index: {}]   ;;  %s2928_s11 = inlined_call_operand.vmem [shape: bf16[2,64,32], index: 11, kind: input, shape index: {}]   ;;  %s2929_s12 = inlined_call_operand.vmem [shape: f32[2,1,32], index: 12, kind: input, shape index: {}]   ;;  %s2930_s13 = inlined_call_operand.vmem [shape: f32[2,1,32], index: 13, kind: input, shape index: {}]   ;;  %s2931_s14 = inlined_call_operand.vmem [shape: f32[2,1,32], index: 14, kind: input, shape index: {}]   ;;  %s2932_s15 = inlined_call_operand.vmem [shape: bf16[32,128], index: 15, kind: input, shape index: {}]   ;;  %s2933_s16 = inlined_call_operand.vmem [shape: f32[1,128], index: 16, kind: input, shape index: {}]   ;;  %s2934_s17 = inlined_call_operand.hbm [shape: f32[2,1,128], index: 17, kind: output, shape index: {0}]   ;;  %s2935_s18 = inlined_call_operand.hbm [shape: f32[2,1,128], index: 18, kind: output, shape index: {1}]  }
   0x1   :  { %2954 = sst [smem:[#allocation23_spill]] %s2917_s0 }
   0x2   :  { %2955 = sst [smem:[#allocation24_spill]] %s2918_s1 }
   0x3   :  { %2956 = sst [smem:[#allocation25_spill]] %s2919_s2 }
   0x4   :  { %2957 = sst [smem:[#allocation26_spill]] %s2920_s3 }
   0x5   :  { %2958 = sst [smem:[#allocation27_spill]] %s2922_s5 }
   0x6   :  { %2959 = sst [smem:[#allocation28_spill]] %s2932_s15 }
   0x7   :  { %2960 = sst [smem:[#allocation29_spill]] %s2933_s16 }
   0x8   :  { %2961 = sst [smem:[#allocation30_spill]] %s2934_s17 }
   0x9   :  { %2962 = sst [smem:[#allocation31_spill]] %s2935_s18 }
   0xa   :  { %24 = vsyncpa [#allocation4], 0 }
   0xb   :  { %26 = vsyncpa [#allocation4 + $0x1], 0 }
   0xc   :  { %27 = vsyncpa [#allocation6], 0 }
   0xd   :  { %29 = vsyncpa [#allocation6 + $0x1], 0  ;;  %s2522_s27 = smov 0   ;;  %s2524_s28 = smov 0  }
   0xe   :  { %s2526_s29 = smov 0   ;;  %s2528_s30 = smov 0  }
   0xf   :  { %s2530_s0 = smov 0   ;;  %s2532_s19 = smov 0  }
  0x10   :  { %s2534_s1 = smov 0   ;;  %s2536_s20 = smov 0  }
  0x11 LB: > { %2963 = sst [smem:[#allocation9_spill]] %s2383_s27  ;;  %s1973_s21 = sadd.s32 4294967295, %s2411_s20   ;;  %s2411_s20 = sphi %s2536_s20, %s35_s20   ;;  %s2407_s1 = sphi %s2534_s1, %s3008_s1   ;;  %s2403_s19 = sphi %s2532_s19, %s3007_s19   ;;  %s2399_s0 = sphi %s2530_s0, %s3006_s0   ;;  %s2395_s30 = sphi %s2528_s30, %s3005_s30   ;;  %s2391_s29 = sphi %s2526_s29, %s3004_s29   ;;  %s2387_s28 = sphi %s2524_s28, %s3003_s28   ;;  %s2383_s27 = sphi %s2522_s27, %s3002_s27  }
  0x12   : > { %2964 = sst [smem:[#allocation10_spill]] %s2387_s28  ;;  %s1974_s22 = sadd.s32 4294967294, %s2411_s20  }
  0x13   : > { %2965 = sst [smem:[#allocation11_spill]] %s2391_s29  ;;  %s44_s2 = sadd.s32 1, %s2403_s19 }
  0x14   : > { %2966 = sst [smem:[#allocation12_spill]] %s2395_s30  ;;  %p45_p0 = scmp.ge.s32.totalorder %s44_s2, 2 }
  0x15   : > { %2967 = sst [smem:[#allocation13_spill]] %s2399_s0  ;;  %s47_s23 = sadd.s32 1, %s2407_s1 }
  0x16   : > { %2968 = sst [smem:[#allocation14_spill]] %s2403_s19  ;;  %p486_p1 = scmp.ne.s32.totalorder %s2391_s29, %s2387_s28 }
  0x17   : > { %2969 = sst [smem:[#allocation15_spill]] %s2407_s1  ;;  %p487_p2 = scmp.eq.s32.totalorder %s1973_s21, 3 }
  0x18   : > { %2970 = sst [smem:[#allocation16_spill]] %s2411_s20  ;;  %s3010_s2 = smov (%p45_p0, %s44_s2), 0 }
  0x19   : > { %2971 = sst [smem:[#allocation17_spill]] %s3010_s2  ;;  %s3012_s23 = smov (!%p45_p0, %s47_s23), %s2407_s1 }
  0x1a   : > { %p2571_p3 = por %p487_p2, %p486_p1  ;;  %p492_p4 = scmp.ne.s32.totalorder %s2387_s28, %s2383_s27 }
  0x1b   : > { %p49_p5 = scmp.ge.s32.totalorder %s3012_s23, 2  ;;  %p493_p6 = scmp.eq.s32.totalorder %s1974_s22, 3 }
  0x1c   : > { %s2972_s24 = scalar_select %p2571_p3, 1, 0 }
  0x1d   : > { %p1977_p7 = scmp.ge.s32.totalorder %s2411_s20, 1  ;;  %p636_p8 = scmp.lt.s32.totalorder %s2411_s20, 5 }
  0x1e   : > { %2973 = sst [smem:[#allocation18_spill]] %s2972_s24  ;;  %s3014_s23 = smov (%p49_p5, %s3012_s23), 0 }
  0x1f   : > { %2974 = sst [smem:[#allocation19_spill]] %s3014_s23  ;;  %p2581_p9 = por %p493_p6, %p492_p4 }
  0x20   : > { %p637_p10 = pnand %p1977_p7, %p636_p8  ;;  %s473_s26 = ssub.s32 %s2407_s1, %s3014_s23 }
  0x21   : > { %s2975_s25 = scalar_select %p2581_p9, 1, 0 }
  0x22   : > { %s476_s21 = sadd.s32 1, %s2391_s29  ;;  %p474_p11 = scmp.eq.s32.totalorder %s473_s26, 0 }
  0x23   : > { %2976 = sst [smem:[#allocation20_spill]] %s2975_s25  ;;  %640 = sbr.rel (%p637_p10) target bundleno = 3585 (0xe01), region = 88 }
  0x24   : > { %s2589_s2 = scalar_select %p474_p11, %s2391_s29, %s476_s21  }
  0x26   : > { %2977 = sst [smem:[#allocation21_spill]] %s2589_s2 }
  0x2a   : > { %s2592_s22 = sand.u32 1, %s2387_s28   ;;  %p736_p12 = scmp.lt.s32.totalorder %s2399_s0, 1 }
  0x2b   : > { %p740_p13 = scmp.lt.s32.totalorder %s2395_s30, 1  ;;  %s2978_s18 = sld [smem:[#allocation23_spill]] }
  0x2c   : > { %s737_s19 = scalar_select %p736_p12, %s2399_s0, 1 }
  0x2d   : > { %s2601_s26 = scalar_select %p740_p13, %s2395_s30, 1 }
  0x2e   : > { %s1978_s27 = sshll.u32 %s737_s19, 3  ;;  %s2979_s3 = sld [smem:[#allocation26_spill]] }
  0x2f   : > { %s2028_s21 = sshll.u32 %s2601_s26, 4  ;;  %s2980_s5 = sld [smem:[#allocation27_spill]] }
  0x30   : > { %s777_s1 = scalar_lea.vmem %s2929_s12, %s2601_s26  ;;  %s783_s30 = scalar_lea.vmem %s2931_s14, %s2601_s26 }
  0x31   : > { %s739_s23 = scalar_lea.vmem %s2978_s18, %s1978_s27  ;;  %s780_s18 = scalar_lea.vmem %s2930_s13, %s2601_s26 }
  0x32   : > { %s729_s29 = scalar_lea.vmem [#allocation3], %s2592_s22  ;;  %s735_s2 = scalar_lea.vmem [#allocation5], %s2592_s22 }
  0x34   : > { %s2611_s25 = scalar_lea.vmem %s2979_s3, %s2028_s21  ;;  %s2633_s3 = scalar_lea.vmem %s2926_s9, %s2028_s21 }
  0x35   : > { %s2616_s28 = scalar_lea.vmem %s2980_s5, %s2028_s21  ;;  %s2982_s5 = sld [smem:[#allocation12_spill]] }
  0x36   : > { %2981 = sst [smem:[#allocation22_spill]] %s2616_s28  ;;  %s2031_s28 = sshll.u32 %s2601_s26, 5 }
  0x37   : > { %s2643_s0 = scalar_lea.vmem %s2928_s11, %s2031_s28 }
  0x3b   : > { %p1987_p0 = scmp.ne.s32.totalorder %s2982_s5, 0 }
  0x3c   : > { %v789_v0 = vld [vmem:[%s739_s23] sm:$0xff] (!%p1987_p0)  ;;  %vm792_vm0 = vcmask (!%p1987_p0), 261120   ;;  %s2983_s20 = sld [smem:[#allocation24_spill]] (!%p1987_p0)  ;;  %s2984_s24 = sld [smem:[#allocation25_spill]] (!%p1987_p0) }
  0x3d   : > { %788 = sbr.rel (%p1987_p0) target bundleno = 375 (0x177), region = 92  ;;  %v793_v1 = vsel (!%p1987_p0), %vm792_vm0, %v789_v0, 0.0 }
  0x3e   : > { %794 = vadd.xlane.f32.xlu0 (!%p1987_p0), %v793_v1 }
  0x42   : > { %v1988_v11 = vld [vmem:[%s2983_s20] ss:$0 sm:$0xff] (!%p1987_p0) }
  0x43   : > { %v1989_v13 = vld [vmem:[%s2984_s24] ss:$0 sm:$0xff] (!%p1987_p0) }
  0xcb   : > { %v795_v2 = vpop.xlane.xlu0 %794 }
  0xcc   : > { %v797_v3 = vmul.f32 0.03125, %v795_v2 }
  0xce   : > { %v798_v4 = vsub.f32 %v789_v0, %v797_v3 }
  0xd0   : > { %v799_v5 = vmul.f32 %v798_v4, %v798_v4 }
  0xd2   : > { %v800_v6 = vsel %vm792_vm0, %v799_v5, 0.0 }
  0xd3   : > { %801 = vadd.xlane.f32.xlu0 %v800_v6 }
 0x160   : > { %v802_v7 = vpop.xlane.xlu0 %801 }
 0x161   : > { %v803_v8 = vmul.f32 0.03125, %v802_v7 }
 0x163   : > { %v804_v9 = vadd.f32 1e-12, %v803_v8 }
 0x165   : > { %2245 = vrsqrt.f32 %v804_v9 }
 0x16f   : > { %v2246_v10 = vpop.eup %2245 }
 0x170   : > { %v806_v12 = vmul.f32 %v2246_v10, %v798_v4 }
 0x172   : > { %v813_v14 = vmul.f32 %v1988_v11, %v806_v12 }
 0x174   : > { %v820_v15 = vadd.f32 %v1989_v13, %v813_v14 }
 0x176   : > { %821 = vst.msk [vmem:[#allocation2] sm:$0xff] %vm792_vm0, %v820_v15 }
 0x177 PF: > { %v2247_v16 = vld [vmem:[%s2611_s25] sm:$0xff]   ;;  %v2413_v17 = vmov 0.0   ;;  %v2248_v18 = vld [vmem:[%s2611_s25 + $0x8] sm:$0xff]   ;;  %vm2414_vm1 = vmmov 0   ;;  %vm847_vm2 = vcmask 261120   ;;  %s2985_s16 = scalar_lea.vmem %s2921_s4, %s2601_s26  ;;  %s2415_s19 = smov 104  }
 0x178   : > { %2065 = vmatprep.subr.bf16.mxu0 %v2413_v17  ;;  %2073 = vmatprep.subr.bf16.mxu1 %v2413_v17  ;;  %v1990_v21 = vld [vmem:[%s2985_s16] ss:$0 sm:$0xff]  ;;  %s2416_s21 = smov 120   ;;  %s2417_s27 = smov 112   ;;  %vm908_vm3 = vcmask 64512   ;;  %vm1155_vm4 = vcmask 1043456  }
 0x179   : > { %2066 = vmatpush3.bf16.msra.mxu0 %v2247_v16  ;;  %2069 = vmatprep.mubr.msk.bf16.mxu0 %vm2414_vm1, %v2413_v17  ;;  %s2418_s28 = smov 96   ;;  %s2419_s5 = smov 64   ;;  %vm1356_vm5 = vcmask 130048   ;;  %vm1358_vm6 = vcmask 195584   ;;  %vm1574_vm7 = vcmask 523264  }
 0x17a   : > { %2067 = vmatprep.subr.bf16.mxu0 %v2413_v17  ;;  %2075 = vmatprep.mubr.msk.bf16.mxu1 %vm2414_vm1, %v2413_v17  ;;  %s2986_s20 = sld [smem:[#allocation22_spill]]  ;;  %s2420_s23 = smov 8  }
 0x17b   : > { %s2421_s17 = smov 16   ;;  %s2422_s24 = smov 24  }
 0x17c   : > { %s2987_s16 = scalar_lea.vmem %s2923_s6, %s2601_s26 }
 0x17d   : > { %v2675_v19 = vld [vmem:[#allocation2] sm:$0xff]  ;;  %2068 = vmatpush3.bf16.msra.mxu0 %v2248_v18 }
 0x17e   : > { %v823_v20 = vpack.c.bf16 %v2675_v19, %v2675_v19  ;;  %2079 = vmatprep.subr.bf16.mxu0 %v2413_v17 }
 0x180   : > { %2070 = vmatmul.mubr.msk.bf16.vlgmr.msra.gmra.mrb[0].mxu0 %vm847_vm2, %v823_v20 }
 0x181   : > { %2081 = vmatprep.mubr.msk.bf16.mxu0 %vm2414_vm1, %v2413_v17 }
 0x253   : > { %v885_v22 = vpop.f32.mrb[0].mxu0 }
 0x254   : > { %v886_v23 = vadd.f32 %v1990_v21, %v885_v22  ;;  %v2071_v24 = vpop.f32.mrb[1].mxu0 }
 0x255   : > { %v888_v25 = vpop.f32.mrb[2].mxu0 }
 0x256   : > { %898 = vrot.lane.b32.xlu1 %v886_v23, %s2415_s19  ;;  %892 = vrot.lane.b32.xlu0 %v886_v23, %s2416_s21  ;;  %v2072_v26 = vpop.f32.mrb[3].mxu0  ;;  %v2691_v27 = vpack.c.bf16 %v886_v23, %v886_v23  ;;  %s2991_s19 = sld [smem:[#allocation12_spill]] }
 0x25a   : > { %895 = vrot.lane.b32.xlu0 %v886_v23, %s2417_s27  ;;  %906 = vrot.lane.b32.xlu1 %v2691_v27, %s2418_s28  ;;  %s2988_s27 = scalar_lea.vmem %s2924_s7, %s2601_s26 }
 0x25c   : > { %p2020_p1 = scmp.ne.s32.totalorder %s2991_s19, 1 }
 0x25d   : > { %vm2424_vm8 = vmmov (!%p2020_p1), 0   ;;  %vm1716_vm9 = vcmask (!%p2020_p1), 1040384  }
 0x2c8   : > { %v899_v28 = vpop.permute.xlu1 %898  ;;  %v893_v29 = vpop.permute.xlu0 %892 }
 0x2c9   : > { %v902_v30 = vpack.c.bf16 %v893_v29, %v893_v29  ;;  %v2694_v33 = vpack.c.bf16 %v899_v28, %v899_v28 }
 0x2cb   : > { %956 = vrot.lane.b32.xlu0 %v902_v30, %s2418_s28 }
 0x2cc   : > { %v896_v31 = vpop.permute.xlu0 %895  ;;  %v907_v32 = vpop.permute.xlu1 %906 }
 0x2cd   : > { %v2696_v34 = vpack.c.bf16 %v896_v31, %v896_v31  ;;  %v913_v35 = vsel %vm908_vm3, %v907_v32, 0 }
 0x2ce   : > { %2074 = vmatpush3.bf16.xpose.msra.mxu1 %v913_v35 }
 0x2cf   : > { %1054 = vrot.lane.b32.xlu0 %v2694_v33, %s2418_s28  ;;  %1005 = vrot.lane.b32.xlu1 %v2696_v34, %s2418_s28 }
 0x2d0   : > { %2085 = vmatprep.subr.bf16.mxu1 %v2413_v17 }
 0x2d5   : > { %2076 = vmatmul.mubr.msk.bf16.vlgmr.msra.gmra.mrb[0].mxu1 %vm908_vm3, %v2691_v27 }
 0x2d6   : > { %2087 = vmatprep.mubr.msk.bf16.mxu1 %vm2414_vm1, %v2413_v17 }
 0x33d   : > { %v957_v36 = vpop.permute.xlu0 %956 }
 0x33e   : > { %v962_v37 = vsel %vm908_vm3, %v957_v36, 0 }
 0x33f   : > { %2080 = vmatpush3.bf16.xpose.msra.mxu0 %v962_v37 }
 0x340   : > { %2091 = vmatprep.subr.bf16.mxu0 %v2413_v17 }
 0x341   : > { %v1006_v38 = vpop.permute.xlu1 %1005  ;;  %v1055_v40 = vpop.permute.xlu0 %1054 }
 0x342   : > { %v1011_v39 = vsel %vm908_vm3, %v1006_v38, 0  ;;  %v1060_v41 = vsel %vm908_vm3, %v1055_v40, 0 }
 0x343   : > { %2086 = vmatpush3.bf16.xpose.msra.mxu1 %v1011_v39 }
 0x344   : > { %2097 = vmatprep.subr.bf16.mxu1 %v2413_v17 }
 0x346   : > { %2082 = vmatmul.mubr.msk.bf16.vlgmr.msra.gmra.mrb[4].mxu0 %vm908_vm3, %v902_v30 }
 0x347   : > { %2092 = vmatpush3.bf16.xpose.msra.mxu0 %v1060_v41  ;;  %2093 = vmatprep.mubr.msk.bf16.mxu0 %vm2414_vm1, %v2413_v17 }
 0x348   : > { %2103 = vmatprep.subr.bf16.mxu0 %v2413_v17 }
 0x34a   : > { %2088 = vmatmul.mubr.msk.bf16.vlgmr.msra.gmra.mrb[4].mxu1 %vm908_vm3, %v2696_v34 }
 0x34b   : > { %2099 = vmatprep.mubr.msk.bf16.mxu1 %vm2414_vm1, %v2413_v17 }
 0x34e   : > { %2094 = vmatmul.mubr.msk.bf16.vlgmr.msra.gmra.mrb[8].mxu0 %vm908_vm3, %v2694_v33 }
 0x34f   : > { %2105 = vmatprep.mubr.msk.bf16.mxu0 %vm2414_vm1, %v2413_v17 }
 0x3a8   : > { %v949_v42 = vpop.f32.mrb[0].mxu1 }
 0x3a9   : > { %v2077_v43 = vpop.f32.mrb[1].mxu1  ;;  %v1102_v44 = vsel %vm908_vm3, %v949_v42, -inf }
 0x3aa   : > { %1103 = vmax.xlane.f32.xlu1 %v1102_v44  ;;  %v952_v45 = vpop.f32.mrb[2].mxu1 }
 0x3ab   : > { %v2078_v46 = vpop.f32.mrb[3].mxu1 }
 0x419   : > { %v998_v47 = vpop.f32.mrb[4].mxu0 }
 0x41a   : > { %v2083_v48 = vpop.f32.mrb[5].mxu0  ;;  %v1105_v49 = vsel %vm908_vm3, %v998_v47, -inf }
 0x41b   : > { %1106 = vmax.xlane.f32.xlu0 %v1105_v49  ;;  %v1001_v50 = vpop.f32.mrb[6].mxu0  ;;  %v2249_v48 = vld [vmem:[%s2986_s20] sm:$0xff]   ;;  %v2250_v49 = vld [vmem:[%s2986_s20 + $0x8] sm:$0xff]   ;;  %s2994_s20 = sld [smem:[#allocation29_spill]] (!%p2020_p1) }
 0x41c   : > { %v2084_v51 = vpop.f32.mrb[7].mxu0 }
 0x41d   : > { %v1047_v52 = vpop.f32.mrb[4].mxu1 }
 0x41e   : > { %v2089_v53 = vpop.f32.mrb[5].mxu1  ;;  %v1108_v54 = vsel %vm908_vm3, %v1047_v52, -inf }
 0x41f   : > { %v1050_v55 = vpop.f32.mrb[6].mxu1  ;;  %1109 = vmax.xlane.f32.xlu0 %v1108_v54 }
 0x420   : > { %v2090_v56 = vpop.f32.mrb[7].mxu1 }
 0x421   : > { %v1096_v57 = vpop.f32.mrb[8].mxu0 }
 0x422   : > { %v2095_v58 = vpop.f32.mrb[9].mxu0  ;;  %v1111_v59 = vsel %vm908_vm3, %v1096_v57, -inf }
 0x423   : > { %1112 = vmax.xlane.f32.xlu1 %v1111_v59  ;;  %v1099_v60 = vpop.f32.mrb[10].mxu0 }
 0x424   : > { %v2096_v61 = vpop.f32.mrb[11].mxu0 }
 0x434   : > { %1199 = vrot.lane.b32.xlu1 %v902_v30, %s2419_s5 }
 0x435   : > { %1150 = vrot.lane.b32.xlu0 %v2691_v27, %s2419_s5 }
 0x437   : > { %v1104_v62 = vpop.xlane.xlu1 %1103 }
 0x438   : > { %v1114_v63 = vsub.f32 %v949_v42, %v1104_v62 }
 0x43a   : > { %v1118_v0 = vmul.f32 1.442695, %v1114_v63 }
 0x43c   : > { %2257 = vpow2.f32 %v1118_v0 }
 0x446   : > { %v2258_v1 = vpop.eup %2257 }
 0x447   : > { %v1126_v2 = vsel %vm908_vm3, %v2258_v1, 0.0 }
 0x454   : > { %1127 = vadd.xlane.f32.xlu0 %v1126_v2 }
 0x4a8   : > { %v1107_v3 = vpop.xlane.xlu0 %1106 }
 0x4a9   : > { %v1115_v4 = vsub.f32 %v998_v47, %v1107_v3 }
 0x4ab   : > { %v1120_v5 = vmul.f32 1.442695, %v1115_v4 }
 0x4ac   : > { %v1110_v6 = vpop.xlane.xlu0 %1109 }
 0x4ad   : > { %2259 = vpow2.f32 %v1120_v5  ;;  %v1116_v7 = vsub.f32 %v1047_v52, %v1110_v6  ;;  %v2002_v5 = vld [vmem:[%s2987_s16] ss:$0 sm:$0xff] }
 0x4af   : > { %v1122_v8 = vmul.f32 1.442695, %v1116_v7 }
 0x4b0   : > { %v1151_v9 = vpop.permute.xlu0 %1150  ;;  %v1113_v10 = vpop.xlane.xlu1 %1112 }
 0x4b1   : > { %2261 = vpow2.f32 %v1122_v8  ;;  %v1157_v11 = vsel %vm1155_vm4, %v1151_v9, 0  ;;  %v1117_v12 = vsub.f32 %v1096_v57, %v1113_v10 }
 0x4b2   : > { %2098 = vmatpush3.bf16.msra.mxu1 %v1157_v11 }
 0x4b3   : > { %v1124_v13 = vmul.f32 1.442695, %v1117_v12  ;;  %2109 = vmatprep.subr.bf16.mxu1 %v2413_v17 }
 0x4b4   : > { %v1200_v14 = vpop.permute.xlu1 %1199 }
 0x4b5   : > { %2263 = vpow2.f32 %v1124_v13  ;;  %v1205_v15 = vsel %vm1155_vm4, %v1200_v14, 0 }
 0x4b6   : > { %2104 = vmatpush3.bf16.msra.mxu0 %v1205_v15 }
 0x4b7   : > { %v2260_v16 = vpop.eup %2259  ;;  %2115 = vmatprep.subr.bf16.mxu0 %v2413_v17 }
 0x4b8   : > { %v1129_v18 = vsel %vm908_vm3, %v2260_v16, 0.0 }
 0x4b9   : > { %1130 = vadd.xlane.f32.xlu1 %v1129_v18 }
 0x4bb   : > { %v2262_v20 = vpop.eup %2261 }
 0x4bc   : > { %v1132_v21 = vsel %vm908_vm3, %v2262_v20, 0.0 }
 0x4bd   : > { %1133 = vadd.xlane.f32.xlu0 %v1132_v21  ;;  %v2252_v21 = vld [vmem:[%s2633_s3 + $0x8] sm:$0xff]  }
 0x4bf   : > { %v2264_v22 = vpop.eup %2263 }
 0x4c0   : > { %v1135_v23 = vsel %vm908_vm3, %v2264_v22, 0.0 }
 0x4c1   : > { %1136 = vadd.xlane.f32.xlu1 %v1135_v23 }
 0x4d2   : > { %1247 = vrot.lane.b32.xlu1 %v2696_v34, %s2419_s5 }
 0x4d3   : > { %1295 = vrot.lane.b32.xlu0 %v2694_v33, %s2419_s5 }
 0x4e1   : > { %v1128_v24 = vpop.xlane.xlu0 %1127 }
 0x4e2   : > { %2265 = vrcp.f32 %v1128_v24 }
 0x4ec   : > { %v2266_v25 = vpop.eup %2265 }
 0x4ed   : > { %v1142_v26 = vmul.f32 %v2266_v25, %v2258_v1  ;;  %v2006_v25 = vld [vmem:[%s2988_s27] ss:$0 sm:$0xff]  ;;  %s2992_s27 = sld [smem:[#allocation28_spill]] (!%p2020_p1) }
 0x4ef   : > { %v1146_v27 = vpack.c.bf16 %v1142_v26, %v1142_v26 }
 0x4f1   : > { %2100 = vmatmul.mubr.msk.bf16.vlgmr.msra.gmra.mrb[8].mxu1 %vm908_vm3, %v1146_v27 }
 0x4f2   : > { %2111 = vmatprep.mubr.msk.bf16.mxu1 %vm2414_vm1, %v2413_v17 }
 0x4f3   : > { %s2993_s5 = smov (!%p2020_p1), %s2992_s27 }
 0x546   : > { %v1131_v28 = vpop.xlane.xlu1 %1130 }
 0x547   : > { %2267 = vrcp.f32 %v1131_v28 }
 0x54a   : > { %v1134_v29 = vpop.xlane.xlu0 %1133 }
 0x54b   : > { %2269 = vrcp.f32 %v1134_v29 }
 0x54e   : > { %v1137_v30 = vpop.xlane.xlu1 %1136  ;;  %v1296_v33 = vpop.permute.xlu0 %1295 }
 0x54f   : > { %2271 = vrcp.f32 %v1137_v30  ;;  %v1301_v39 = vsel %vm1155_vm4, %v1296_v33, 0  ;;  %v2256_v33 = vld [vmem:[%s2643_s0 + $0x18] sm:$0xff]  }
 0x551   : > { %v2268_v31 = vpop.eup %2267 }
 0x552   : > { %v1143_v32 = vmul.f32 %v2268_v31, %v2260_v16  ;;  %v1248_v34 = vpop.permute.xlu1 %1247  ;;  %v2253_v31 = vld [vmem:[%s2643_s0] sm:$0xff]  }
 0x553   : > { %v1253_v35 = vsel %vm1155_vm4, %v1248_v34, 0  ;;  %v2255_v34 = vld [vmem:[%s2643_s0 + $0x10] sm:$0xff]  }
 0x554   : > { %2110 = vmatpush3.bf16.msra.mxu1 %v1253_v35  ;;  %v1147_v36 = vpack.c.bf16 %v1143_v32, %v1143_v32  ;;  %v2254_v32 = vld [vmem:[%s2643_s0 + $0x8] sm:$0xff]  }
 0x555   : > { %v2270_v37 = vpop.eup %2269  ;;  %2121 = vmatprep.subr.bf16.mxu1 %v2413_v17 }
 0x556   : > { %v1144_v38 = vmul.f32 %v2270_v37, %v2262_v20  ;;  %2106 = vmatmul.mubr.msk.bf16.vlgmr.msra.gmra.mrb[12].mxu0 %vm908_vm3, %v1147_v36  ;;  %v2251_v20 = vld [vmem:[%s2633_s3] sm:$0xff]   ;;  %s2989_s3 = scalar_lea.vmem %s2925_s8, %s2601_s26 }
 0x557   : > { %2116 = vmatpush3.bf16.msra.mxu0 %v1301_v39  ;;  %2117 = vmatprep.mubr.msk.bf16.mxu0 %vm2414_vm1, %v2413_v17  ;;  %v2007_v27 = vld [vmem:[%s2989_s3] ss:$0 sm:$0xff] }
 0x558   : > { %v1148_v40 = vpack.c.bf16 %v1144_v38, %v1144_v38  ;;  %2129 = vmatprep.subr.bf16.mxu0 %v2413_v17 }
 0x559   : > { %v2272_v41 = vpop.eup %2271 }
 0x55a   : > { %v1145_v42 = vmul.f32 %v2272_v41, %v2264_v22  ;;  %2112 = vmatmul.mubr.msk.bf16.vlgmr.msra.gmra.mrb[12].mxu1 %vm908_vm3, %v1148_v40 }
 0x55b   : > { %2125 = vmatprep.mubr.msk.bf16.mxu1 %vm2414_vm1, %v2413_v17  ;;  %2122 = vmatpush3.bf16.msra.mxu1 %v2249_v48 }
 0x55c   : > { %v1149_v43 = vpack.c.bf16 %v1145_v42, %v1145_v42  ;;  %2123 = vmatprep.subr.bf16.mxu1 %v2413_v17 }
 0x55e   : > { %2118 = vmatmul.mubr.msk.bf16.vlgmr.msra.gmra.mrb[16].mxu0 %vm908_vm3, %v1149_v43 }
 0x55f   : > { %2133 = vmatprep.mubr.msk.bf16.mxu0 %vm2414_vm1, %v2413_v17  ;;  %2124 = vmatpush3.bf16.msra.mxu1 %v2250_v49 }
 0x560   : > { %2137 = vmatprep.subr.bf16.mxu1 %v2413_v17  ;;  %2130 = vmatpush3.bf16.msra.mxu0 %v2251_v20 }
 0x561   : > { %2131 = vmatprep.subr.bf16.mxu0 %v2413_v17 }
 0x564   : > { %2132 = vmatpush3.bf16.msra.mxu0 %v2252_v21 }
 0x5c4   : > { %v1193_v44 = vpop.f32.mrb[8].mxu1 }
 0x5c5   : > { %v2101_v45 = vpop.f32.mrb[9].mxu1 }
 0x5c6   : > { %v1196_v46 = vpop.f32.mrb[10].mxu1 }
 0x5c7   : > { %v2102_v47 = vpop.f32.mrb[11].mxu1 }
 0x629   : > { %v1241_v50 = vpop.f32.mrb[12].mxu0 }
 0x62a   : > { %1344 = vrot.lane.b32.xlu1 %v1241_v50, %s2420_s23  ;;  %v2107_v51 = vpop.f32.mrb[13].mxu0  ;;  %v2012_v50 = vld [vmem:[%s777_s1] ss:$0 sm:$0xff] }
 0x62b   : > { %v1244_v52 = vpop.f32.mrb[14].mxu0 }
 0x62c   : > { %v2108_v53 = vpop.f32.mrb[15].mxu0 }
 0x62d   : > { %v1289_v54 = vpop.f32.mrb[12].mxu1 }
 0x62e   : > { %1348 = vrot.lane.b32.xlu0 %v1289_v54, %s2421_s17  ;;  %v2113_v55 = vpop.f32.mrb[13].mxu1  ;;  %s2990_s17 = scalar_lea.vmem %s2927_s10, %s2601_s26 }
 0x62f   : > { %v1292_v56 = vpop.f32.mrb[14].mxu1  ;;  %v2008_v35 = vld [vmem:[%s2990_s17] ss:$0 sm:$0xff] }
 0x630   : > { %v2114_v57 = vpop.f32.mrb[15].mxu1 }
 0x631   : > { %v1337_v58 = vpop.f32.mrb[16].mxu0 }
 0x632   : > { %1352 = vrot.lane.b32.xlu1 %v1337_v58, %s2422_s24  ;;  %v2119_v59 = vpop.f32.mrb[17].mxu0 }
 0x633   : > { %v1340_v60 = vpop.f32.mrb[18].mxu0 }
 0x634   : > { %v2120_v61 = vpop.f32.mrb[19].mxu0 }
 0x69c   : > { %v1345_v62 = vpop.permute.xlu1 %1344 }
 0x69d   : > { %v1355_v0 = vsel %vm908_vm3, %v1193_v44, %v1345_v62 }
 0x6a0   : > { %v1349_v63 = vpop.permute.xlu0 %1348 }
 0x6a1   : > { %v1357_v1 = vsel %vm1356_vm5, %v1355_v0, %v1349_v63 }
 0x6a4   : > { %v1353_v2 = vpop.permute.xlu1 %1352 }
 0x6a5   : > { %v1359_v3 = vsel %vm1358_vm6, %v1357_v1, %v1353_v2 }
 0x6a6   : > { %v1360_v4 = vpack.c.bf16 %v1359_v3, %v1359_v3  ;;  %v2018_v3 = vld [vmem:[%s780_s18] ss:$0 sm:$0xff] }
 0x6a8   : > { %2126 = vmatmul.mubr.msk.bf16.vlgmr.msra.gmra.mrb[16].mxu1 %vm847_vm2, %v1360_v4 }
 0x6a9   : > { %2145 = vmatprep.mubr.msk.bf16.mxu1 %vm2414_vm1, %v2413_v17  ;;  %2138 = vmatpush3.bf16.msra.mxu1 %v2253_v31 }
 0x6aa   : > { %2139 = vmatprep.subr.bf16.mxu1 %v2413_v17 }
 0x6ad   : > { %2140 = vmatpush3.bf16.msra.mxu1 %v2254_v32 }
 0x6ae   : > { %2141 = vmatprep.subr.bf16.mxu1 %v2413_v17 }
 0x6b1   : > { %2142 = vmatpush3.bf16.msra.mxu1 %v2255_v34 }
 0x6b2   : > { %2143 = vmatprep.subr.bf16.mxu1 %v2413_v17 }
 0x6b5   : > { %2144 = vmatpush3.bf16.msra.mxu1 %v2256_v33 }
 0x77b   : > { %v1421_v6 = vpop.f32.mrb[16].mxu1 }
 0x77c   : > { %v1422_v7 = vadd.f32 %v2002_v5, %v1421_v6  ;;  %v2127_v8 = vpop.f32.mrb[17].mxu1  ;;  %v2019_v5 = vld [vmem:[%s783_s30] ss:$0 sm:$0xff] }
 0x77d   : > { %v1424_v9 = vpop.f32.mrb[18].mxu1 }
 0x77e   : > { %v2128_v10 = vpop.f32.mrb[19].mxu1  ;;  %v1427_v11 = vadd.f32 %v1422_v7, %v2675_v19  ;;  %v2423_v9 = vmov (!%p2020_p1), 0.0  }
 0x77f   : > { %2149 = vmatprep.subr.bf16.mxu0 (!%p2020_p1), %v2423_v9  ;;  %v2279_v10 = vld [vmem:[%s2992_s27] sm:$0xff] (!%p2020_p1)  }
 0x780   : > { %v1430_v12 = vsel %vm847_vm2, %v1427_v11, 0.0 }
 0x781   : > { %1431 = vadd.xlane.f32.xlu0 %v1430_v12 }
 0x80e   : > { %v1432_v13 = vpop.xlane.xlu0 %1431 }
 0x80f   : > { %v1434_v14 = vmul.f32 0.03125, %v1432_v13  ;;  %v1660_v13 = vld [vmem:[%s2994_s20] sm:$0x1] (!%p2020_p1) }
 0x811   : > { %v1435_v15 = vsub.f32 %v1427_v11, %v1434_v14  ;;  %v2280_v11 = vld [vmem:[%s2993_s5 + $0x8] sm:$0xff] (!%p2020_p1)  }
 0x813   : > { %v1436_v16 = vmul.f32 %v1435_v15, %v1435_v15 }
 0x815   : > { %v1437_v18 = vsel %vm847_vm2, %v1436_v16, 0.0 }
 0x816   : > { %1438 = vadd.xlane.f32.xlu1 %v1437_v18 }
 0x8a3   : > { %v1439_v19 = vpop.xlane.xlu1 %1438 }
 0x8a4   : > { %v1440_v22 = vmul.f32 0.03125, %v1439_v19 }
 0x8a6   : > { %v1441_v23 = vadd.f32 1e-12, %v1440_v22 }
 0x8a8   : > { %2273 = vrsqrt.f32 %v1441_v23 }
 0x8b2   : > { %v2274_v24 = vpop.eup %2273 }
 0x8b3   : > { %v1443_v26 = vmul.f32 %v2274_v24, %v1435_v15 }
 0x8b5   : > { %v1450_v28 = vmul.f32 %v2006_v25, %v1443_v26 }
 0x8b7   : > { %v1457_v29 = vadd.f32 %v2007_v27, %v1450_v28 }
 0x8b9   : > { %v1458_v30 = vpack.c.bf16 %v1457_v29, %v1457_v29 }
 0x8bb   : > { %2134 = vmatmul.mubr.msk.bf16.vlgmr.msra.gmra.mrb[20].mxu0 %vm847_vm2, %v1458_v30 }
 0x8bc   : > { %2153 = vmatprep.mubr.msk.bf16.mxu0 (!%p2020_p1), %vm2424_vm8, %v2423_v9  ;;  %2150 = vmatpush3.bf16.msra.mxu0 (!%p2020_p1), %v2279_v10 }
 0x8bd   : > { %2151 = vmatprep.subr.bf16.mxu0 (!%p2020_p1), %v2423_v9 }
 0x8c0   : > { %2152 = vmatpush3.bf16.msra.mxu0 (!%p2020_p1), %v2280_v11 }
 0x98e   : > { %v1519_v36 = vpop.f32.mrb[20].mxu0 }
 0x98f   : > { %v1520_v37 = vadd.f32 %v2008_v35, %v1519_v36  ;;  %v2135_v38 = vpop.f32.mrb[21].mxu0 }
 0x990   : > { %v1522_v39 = vpop.f32.mrb[22].mxu0 }
 0x991   : > { %v1526_v40 = vmul.f32 0.044715, %v1520_v37  ;;  %v2136_v41 = vpop.f32.mrb[23].mxu0  ;;  %v1525_v17 = vmul.f32 0.5, %v1520_v37 }
 0x993   : > { %v1527_v42 = vmul.f32 %v1526_v40, %v1520_v37 }
 0x995   : > { %v1528_v43 = vmul.f32 %v1527_v42, %v1520_v37 }
 0x997   : > { %v1529_v44 = vadd.f32 %v1528_v43, %v1520_v37 }
 0x999   : > { %v1530_v45 = vmul.f32 0.7978846, %v1529_v44 }
 0x99b   : > { %2275 = vtanh.f32 %v1530_v45 }
 0x9a5   : > { %v2276_v46 = vpop.eup %2275 }
 0x9a6   : > { %v1532_v47 = vadd.f32 1.0, %v2276_v46 }
 0x9a8   : > { %v1533_v48 = vmul.f32 %v1532_v47, %v1525_v17 }
 0x9aa   : > { %v1534_v49 = vpack.c.bf16 %v1533_v48, %v1533_v48 }
 0x9ac   : > { %2146 = vmatmul.mubr.msk.bf16.vlgmr.msra.gmra.mrb[20].mxu1 %vm1574_vm7, %v1534_v49 }
 0xa7f   : > { %v1612_v51 = vpop.f32.mrb[20].mxu1 }
 0xa80   : > { %v1613_v52 = vadd.f32 %v2012_v50, %v1612_v51  ;;  %v2147_v53 = vpop.f32.mrb[21].mxu1 }
 0xa81   : > { %v1615_v54 = vpop.f32.mrb[22].mxu1 }
 0xa82   : > { %v2148_v55 = vpop.f32.mrb[23].mxu1  ;;  %v1618_v56 = vadd.f32 %v1613_v52, %v1457_v29 }
 0xa84   : > { %v1621_v57 = vsel %vm847_vm2, %v1618_v56, 0.0 }
 0xa85   : > { %1622 = vadd.xlane.f32.xlu0 %v1621_v57 }
 0xb12   : > { %v1623_v58 = vpop.xlane.xlu0 %1622 }
 0xb13   : > { %v1624_v59 = vmul.f32 0.03125, %v1623_v58 }
 0xb15   : > { %v1625_v60 = vsub.f32 %v1618_v56, %v1624_v59 }
 0xb17   : > { %v1626_v61 = vmul.f32 %v1625_v60, %v1625_v60 }
 0xb19   : > { %v1627_v62 = vsel %vm847_vm2, %v1626_v61, 0.0 }
 0xb1a   : > { %1628 = vadd.xlane.f32.xlu0 %v1627_v62 }
 0xba7   : > { %v1629_v63 = vpop.xlane.xlu0 %1628 }
 0xba8   : > { %v1630_v0 = vmul.f32 0.03125, %v1629_v63 }
 0xbaa   : > { %v1631_v1 = vadd.f32 1e-12, %v1630_v0 }
 0xbac   : > { %2277 = vrsqrt.f32 %v1631_v1 }
 0xbb6   : > { %v2278_v2 = vpop.eup %2277 }
 0xbb7   : > { %v1633_v4 = vmul.f32 %v2278_v2, %v1625_v60  ;;  %1652 = sbr.rel (%p2020_p1) target bundleno = 3536 (0xdd0), region = 96 }
 0xbb9   : > { %v1640_v6 = vmul.f32 %v2018_v3, %v1633_v4 }
 0xbbb   : > { %v1647_v7 = vadd.f32 %v2019_v5, %v1640_v6 }
 0xbbd   : > { %1648 = vst.msk [vmem:[#allocation2] sm:$0xff] %vm847_vm2, %v1647_v7  ;;  %v1653_v8 = vsel (!%p2020_p1), %vm847_vm2, %v1647_v7, 0.0  ;;  %v1655_v12 = vpack.c.bf16 (!%p2020_p1), %v1647_v7, %v1647_v7 }
 0xbbe   : > { %1654 = vst [vmem:[%s729_s29] sm:$0x1] %v1653_v8 }
 0xbbf   : > { %2154 = vmatmul.mubr.msk.bf16.vlgmr.msra.gmra.mrb[0].mxu0 %vm847_vm2, %v1655_v12 }
 0xc92   : > { %v1710_v14 = vpop.f32.mrb[0].mxu0 }
 0xc93   : > { %v1711_v15 = vadd.f32 %v1710_v14, %v1660_v13  ;;  %v2155_v16 = vpop.f32.mrb[1].mxu0 }
 0xc94   : > { %v1713_v18 = vpop.f32.mrb[2].mxu0 }
 0xc95   : > { %v2156_v20 = vpop.f32.mrb[3].mxu0  ;;  %v1717_v21 = vsel %vm1716_vm9, %v1711_v15, -inf }
 0xc96   : > { %1718 = vmax.xlane.f32.xlu0 %v1717_v21 }
 0xd23   : > { %v1719_v19 = vpop.xlane.xlu0 %1718 }
 0xd24   : > { %v1720_v22 = vsub.f32 %v1711_v15, %v1719_v19 }
 0xd26   : > { %v1721_v23 = vmul.f32 1.442695, %v1720_v22 }
 0xd28   : > { %2281 = vpow2.f32 %v1721_v23 }
 0xd32   : > { %v2282_v24 = vpop.eup %2281 }
 0xd33   : > { %v1723_v25 = vsel %vm1716_vm9, %v2282_v24, 0.0 }
 0xd34   : > { %1724 = vadd.xlane.f32.xlu0 %v1723_v25 }
 0xdc1   : > { %v1725_v26 = vpop.xlane.xlu0 %1724 }
 0xdc2   : > { %2283 = vrcp.f32 %v1725_v26 }
 0xdcc   : > { %v2284_v27 = vpop.eup %2283 }
 0xdcd   : > { %v1727_v28 = vmul.f32 %v2284_v27, %v2282_v24 }
 0xdcf   : > { %1728 = vst [vmem:[%s735_s2] sm:$0x1] %v1727_v28 }
 0xdd0 PF: > { %s2995_s23 = sld [smem:[#allocation13_spill]]  ;;  %s2997_s25 = sld [smem:[#allocation30_spill]] }
 0xdd1   : > { %s1746_s16 = sshll.u32 %s729_s29, 4  ;;  %s1730_s19 = scalar_lea.sflag [#allocation4], %s2592_s22  ;;  %s1747_s16 = int_to_ptr.vmem [resolvable:$true] %s1746_s16 }
 0xdd2   : > { %s2285_s18 = scalar_lea.vmem %s1747_s16, 16  ;;  %s2425_s21 = smov [#allocation3]  }
 0xdd3   : > { %p2286_p2 = scmp.ne.s32.totalorder %s1747_s16, %s2285_s18  ;;  %s2289_s27 = sshll.u32 %s2425_s21, 4  ;;  %s2290_s27 = int_to_ptr.vmem [resolvable:$false] %s2289_s27 }
 0xdd4   : > { %s2291_s30 = scalar_lea.vmem %s2290_s27, 32  ;;  %p2292_p6 = scmp.lt.s32.totalorder %s1747_s16, %s2290_s27 }
 0xdd5   : > { %p2287_p4 = pnand %p2286_p2, %p2571_p3  ;;  %p2293_p7 = scmp.lt.s32.totalorder %s2291_s30, %s2285_s18 }
 0xdd6   : > { %s2024_s0 = sshll.u32 %s2995_s23, 4 }
 0xdd7   : > { %s2840_s15 = scalar_lea.hbm %s2997_s25, %s2024_s0  ;;  %p2288_p5 = pneg %p2287_p4 }
 0xdd8   : > { %p2294_p8 = por %p2293_p7, %p2292_p6 }
 0xdda   : > { %p2295_p10 = pnand %p2294_p8, %p2288_p5 }
 0xddc   : > { %2298 = shalt.err (!%p2295_p10)
}
 0xddd   : > { %s2299_s29 = scalar_lea.hbm %s2840_s15, 16  ;;  %s2303_s3 = scalar_lea.hbm %s2997_s25, 32 }
 0xdde   : > { %p2300_p11 = scmp.ne.s32.totalorder %s2840_s15, %s2299_s29  ;;  %p2304_p0 = scmp.lt.u32.totalorder %s2840_s15, %s2997_s25 }
 0xddf   : > { %p2305_p1 = scmp.lt.u32.totalorder %s2303_s3, %s2299_s29  ;;  %p2307_p4 = scmp.lt.u32.totalorder %s2299_s29, %s2840_s15 }
 0xde0   : > { %p2301_p12 = pnand %p2300_p11, %p2571_p3 }
 0xde1   : > { %p2306_p2 = por %p2305_p1, %p2304_p0 }
 0xde2   : > { %p2302_p13 = pneg %p2301_p12 }
 0xde3   : > { %p2308_p5 = por %p2307_p4, %p2306_p2 }
 0xde5   : > { %p2309_p6 = pnand %p2308_p5, %p2302_p13 }
 0xde7   : > { %2312 = shalt.err (!%p2309_p6)
}
 0xde8   : > { %2157 = dma.vmem_to_hbm [thread:$0]  (%p2571_p3), %s1747_s16, 16, %s2840_s15, %s1730_s19  }
 0xde9   : > { %s2998_s21 = sld [smem:[#allocation31_spill]]  ;;  %s1759_s30 = sshll.u32 %s735_s2, 4  ;;  %s1760_s30 = int_to_ptr.vmem [resolvable:$true] %s1759_s30 }
 0xdea   : > { %s1734_s29 = scalar_lea.sflag [#allocation6], %s2592_s22  ;;  %s2313_s26 = scalar_lea.vmem %s1760_s30, 16 }
 0xdeb   : > { %p2314_p7 = scmp.ne.s32.totalorder %s1760_s30, %s2313_s26  ;;  %s2426_s28 = smov [#allocation5]  }
 0xdec   : > { %s2317_s3 = sshll.u32 %s2426_s28, 4  ;;  %s2318_s3 = int_to_ptr.vmem [resolvable:$false] %s2317_s3 }
 0xded   : > { %p2315_p8 = pnand %p2314_p7, %p2571_p3  ;;  %s2319_s20 = scalar_lea.vmem %s2318_s3, 32 }
 0xdee   : > { %p2320_p11 = scmp.lt.s32.totalorder %s1760_s30, %s2318_s3  ;;  %p2321_p12 = scmp.lt.s32.totalorder %s2319_s20, %s2313_s26 }
 0xdef   : > { %s2867_s27 = scalar_lea.hbm %s2998_s21, %s2024_s0  ;;  %p2316_p10 = pneg %p2315_p8 }
 0xdf0   : > { %p2322_p13 = por %p2321_p12, %p2320_p11 }
 0xdf2   : > { %p2323_p0 = pnand %p2322_p13, %p2316_p10 }
 0xdf4   : > { %2326 = shalt.err (!%p2323_p0)
}
 0xdf5   : > { %s2327_s22 = scalar_lea.hbm %s2867_s27, 16  ;;  %s2331_s0 = scalar_lea.hbm %s2998_s21, 32 }
 0xdf6   : > { %p2328_p1 = scmp.ne.s32.totalorder %s2867_s27, %s2327_s22  ;;  %p2332_p5 = scmp.lt.u32.totalorder %s2867_s27, %s2998_s21 }
 0xdf7   : > { %p2333_p6 = scmp.lt.u32.totalorder %s2331_s0, %s2327_s22  ;;  %p2335_p8 = scmp.lt.u32.totalorder %s2327_s22, %s2867_s27 }
 0xdf8   : > { %p2329_p2 = pnand %p2328_p1, %p2571_p3 }
 0xdf9   : > { %p2334_p7 = por %p2333_p6, %p2332_p5 }
 0xdfa   : > { %p2330_p4 = pneg %p2329_p2 }
 0xdfb   : > { %p2336_p10 = por %p2335_p8, %p2334_p7 }
 0xdfd   : > { %p2337_p11 = pnand %p2336_p10, %p2330_p4 }
 0xdff   : > { %2340 = shalt.err (!%p2337_p11)
}
 0xe00   : > { %2158 = dma.vmem_to_hbm [thread:$0]  (%p2571_p3), %s1760_s30, 16, %s2867_s27, %s1734_s29  }
 0xe01 PF: > { %s2999_s19 = sld [smem:[#allocation16_spill]]  ;;  %s3000_s24 = sld [smem:[#allocation9_spill]] }
 0xe07   : > { %p2168_p12 = scmp.ge.s32.totalorder %s2999_s19, 2  ;;  %s1771_s18 = sand.u32 1, %s3000_s24  }
 0xe08   : > { %s1772_s26 = scalar_lea.sflag [#allocation4], %s1771_s18 }
 0xe09   : > { %p2162_p13 = pnand %p2168_p12, %p2581_p9 }
 0xe0b   : > { %2374 = dma.done.wait (!%p2162_p13), %s1772_s26, 16  }
 0xe0c   : > { %2376 = vsyncadd (!%p2162_p13), %s1772_s26, 4294967280  ;;  %s1780_s28 = scalar_lea.sflag [#allocation6], %s1771_s18 }
 0xe0d   : > { %2378 = dma.done.wait (!%p2162_p13), %s1780_s28, 16  }
 0xe0e   : > { %2380 = vsyncadd (!%p2162_p13), %s1780_s28, 4294967280  ;;  %s35_s20 = sadd.s32 1, %s2999_s19   ;;  %s3002_s27 = sld [smem:[#allocation10_spill]] }
 0xe0f   : > { %p32_p0 = scmp.ge.s32.totalorder %s35_s20, 6   ;;  %s3003_s28 = sld [smem:[#allocation11_spill]] }
 0xe10   : > { %s3004_s29 = sld [smem:[#allocation21_spill]]  ;;  %s3005_s30 = sld [smem:[#allocation14_spill]] }
 0xe11   : > { %s3006_s0 = sld [smem:[#allocation15_spill]]  ;;  %s3007_s19 = sld [smem:[#allocation17_spill]] }
 0xe12   : > { %s3008_s1 = sld [smem:[#allocation19_spill]]  ;;  %34 = sbr.rel (!%p32_p0) target bundleno = 17 (0x11), region = 184 }
 0xe19   :  { %1784 = vsyncpa [#allocation4], 1 }
 0xe1a   :  { %1786 = vsyncpa [#allocation4 + $0x1], 1 }
 0xe1b   :  { %1787 = vsyncpa [#allocation6], 1 }
 0xe1c   :  { %1789 = vsyncpa [#allocation6 + $0x1], 1 }

</bundles_post_ra>
